<compile_context>
chip_gen: v7x
topology: tpu7x:2x2x1
jax: 0.10.0
libtpu: 0.0.40
codegen_flags: <defaults>
</compile_context>

<pallas_src>
import numpy as np
import jax
import jax.numpy as jnp
from jax import lax
from jax.experimental import pallas as pl
from jax.experimental.pallas import tpu as pltpu


def _round_up(x: int, m: int) -> int:
    return ((x + m - 1) // m) * m


# ----------------------------------------------------------------------------
# Pallas kernel: one time-chunk of the LSTM recurrence + dense head.
#   gin_ref : [Tc*Bp, 4H]  precomputed input gates (x @ W_ih + b), f32
#   whh_ref : [H, 4H]      hidden->gate weights (mxu dtype, resident)
#   wd_ref  : [H, Vp]      dense head weights, V padded to 128 (mxu dtype)
#   bd_ref  : [1, Vp]      dense head bias (f32)
#   out_ref : [Tc*Bp, Vp]  logits for this chunk (bf16, lane-dense store)
#   h_sc, c_sc : [Bp, H]   persistent recurrent state (f32, survives grid steps)
#   hbuf_sc : [Tc*Bp, H]   collected hidden states for the chunk (f32)
# ----------------------------------------------------------------------------
def _make_lstm_chunk_kernel(unroll: int):
    def lstm_chunk_kernel(gin_ref, whh_ref, wd_ref, bd_ref, out_ref,
                          h_sc, c_sc, hbuf_sc):
        Bp, H = h_sc.shape
        rows = gin_ref.shape[0]
        Tc = rows // Bp

        # zero initial state (Model.initial_state_batched) only on first chunk
        @pl.when(pl.program_id(0) == 0)
        def _():
            h_sc[...] = jnp.zeros_like(h_sc)
            c_sc[...] = jnp.zeros_like(c_sc)

        # Serial recurrence over the chunk (the only truly sequential part).
        # Per step: one [Bp,H]@[H,4H] matmul + full-vreg activations.
        def step(t, carry):
            r0 = pl.multiple_of(t * Bp, Bp)
            gates = gin_ref[pl.ds(r0, Bp), :] + jnp.dot(
                h_sc[...].astype(whh_ref.dtype), whh_ref[...],
                preferred_element_type=jnp.float32)       # [Bp, 4H] f32
            # One sigmoid + one tanh over the full gate block (2 EUP passes),
            # then cheap slices / VPU elementwise (PyTorch gate order i,f,g,o).
            sig = jax.nn.sigmoid(gates)
            tnh = jnp.tanh(gates)
            i = sig[:, 0 * H:1 * H]
            f = sig[:, 1 * H:2 * H]
            g = tnh[:, 2 * H:3 * H]
            o = sig[:, 3 * H:4 * H]
            c = f * c_sc[...] + i * g
            h = o * jnp.tanh(c)
            c_sc[...] = c
            h_sc[...] = h
            hbuf_sc[pl.ds(r0, Bp), :] = h
            return carry

        lax.fori_loop(0, Tc, step, 0, unroll=unroll)

        # Hoisted dense head: one [Tc*Bp, H] @ [H, Vp] matmul, lane-dense,
        # unmasked bf16 store.
        out_ref[...] = (
            jnp.dot(hbuf_sc[...].astype(wd_ref.dtype), wd_ref[...],
                    preferred_element_type=jnp.float32)
            + bd_ref[...]
        ).astype(out_ref.dtype)

    return lstm_chunk_kernel


def lstm_dense_forward(gin_tbg, w_hh, w_d, b_d, *,
                       t_chunk=32, mxu_dtype=jnp.bfloat16):
    """gin_tbg: [T, B, 4H] f32 (embedded inputs already projected through W_ih
    and biased) -> logits [T, B, V] float32."""
    T, B, G = gin_tbg.shape
    H = w_hh.shape[0]
    assert G == 4 * H
    V = w_d.shape[1]

    # Padding for hardware-friendly layout:
    #   B -> multiple of 8 (f32 sublane), V -> multiple of 128 (lane, unmasked
    #   vst on the output), T -> multiple of the time chunk.
    Bp = _round_up(max(B, 1), 8)
    Vp = _round_up(V, 128)
    Tc = min(t_chunk, max(T, 1))
    Tp = _round_up(T, Tc)
    rows = Tc * Bp

    # Padded streamed input (padded batch/time rows are zero; each batch row's
    # recurrence is independent, so padding never corrupts valid outputs).
    gin_p = jnp.zeros((Tp, Bp, G), jnp.float32).at[:T, :B, :].set(
        gin_tbg.astype(jnp.float32))
    gin2d = gin_p.reshape(Tp * Bp, G)

    whh = w_hh.astype(mxu_dtype)                                   # [H, 4H]
    wd_p = (jnp.zeros((H, Vp), jnp.float32)
            .at[:, :V].set(w_d)).astype(mxu_dtype)                 # [H, Vp]
    bd_p = jnp.zeros((1, Vp), jnp.float32).at[:, :V].set(
        b_d.reshape(1, V))                                         # [1, Vp]

    grid = (Tp // Tc,)
    unroll = Tc if Tc <= 8 else 8
    kernel = _make_lstm_chunk_kernel(unroll)

    # VMEM budget from actual buffers (double-buffered blocks + resident
    # weights + scratch), with headroom, capped for v7x's 64 MiB physical VMEM.
    vmem_need = (
        2 * rows * G * 4            # gin block (f32, double-buffered)
        + 2 * rows * Vp * 2         # out block (bf16, double-buffered)
        + 2 * (H * G + H * Vp) * 2  # resident weights (bf16)
        + 2 * Vp * 4                # dense bias
        + (2 * Bp * H + rows * H) * 4   # scratch h/c/hbuf (f32)
    )
    vmem_limit = int(min(max(4 * vmem_need, 16 * 1024 * 1024),
                         48 * 1024 * 1024))

    out2d = pl.pallas_call(
        kernel,
        out_shape=jax.ShapeDtypeStruct((Tp * Bp, Vp), jnp.bfloat16),
        grid_spec=pltpu.PrefetchScalarGridSpec(
            num_scalar_prefetch=0,
            grid=grid,
            in_specs=[
                pl.BlockSpec((rows, G), lambda i: (i, 0)),   # gin chunk (streamed)
                pl.BlockSpec((H, G), lambda i: (0, 0)),      # w_hh (resident)
                pl.BlockSpec((H, Vp), lambda i: (0, 0)),     # w_dense (resident)
                pl.BlockSpec((1, Vp), lambda i: (0, 0)),     # dense bias
            ],
            out_specs=pl.BlockSpec((rows, Vp), lambda i: (i, 0)),
            scratch_shapes=[
                pltpu.VMEM((Bp, H), jnp.float32),      # h (persists over grid)
                pltpu.VMEM((Bp, H), jnp.float32),      # c (persists over grid)
                pltpu.VMEM((rows, H), jnp.float32),    # hidden states of chunk
            ],
        ),
        compiler_params=pltpu.CompilerParams(
            dimension_semantics=("arbitrary",),        # recurrence is serial in T
            vmem_limit_bytes=vmem_limit,
        ),
    )(gin2d, whh, wd_p, bd_p)

    logits = out2d.reshape(Tp, Bp, Vp)[:T, :B, :V].astype(jnp.float32)
    return logits


# ----------------------------------------------------------------------------
# Model wrapper (embedding fold + packing glue in plain JAX/numpy,
# hot path in Pallas)
# ----------------------------------------------------------------------------
def model_forward(tunes, lens, params):
    """
    tunes: int32 [B, T]   (padded token ids)
    lens : int   [B]      (valid lengths, numpy / python ints)
    returns (pred_data [sum(lens), V] float32, batch_sizes [T_max] int64)
    matching PyTorch PackedSequence (enforce_sorted=False) data/batch_sizes.
    """
    emb = params["embedding"]                      # [V, E], padding row is 0
    w_ih = params["w_ih"]                          # [E, 4H]
    b = params["b"]                                # [1, 4H]

    # Fold embedding + input projection: one [V, E] @ [E, 4H] precompute,
    # amortized across all (t, b) positions; the kernel streams gin directly.
    e_proj = jnp.dot(emb, w_ih, precision=lax.Precision.HIGHEST)   # [V, 4H]
    gin = jnp.take(e_proj, tunes, axis=0) + b                      # [B, T, 4H]
    gin_tbg = jnp.transpose(gin, (1, 0, 2))                        # [T, B, 4H]

    logits = lstm_dense_forward(
        gin_tbg, params["w_hh"], params["w_dense"], params["b_dense"]
    )                                                              # [T, B, V]

    # pack_padded_sequence bookkeeping (host-side glue, static shapes).
    # Note: only data and batch_sizes are returned (sorted/unsorted index
    # tensors of PackedSequence are not reproduced).
    lens_np = np.asarray(lens)
    order = np.argsort(-lens_np, kind="stable")    # descending-length order
    T_max = int(lens_np.max())
    batch_sizes = np.array([int((lens_np > t).sum()) for t in range(T_max)],
                           dtype=np.int64)
    time_idx, batch_idx = [], []
    for t in range(T_max):
        for b_ in order:
            if lens_np[b_] > t:
                time_idx.append(t)
                batch_idx.append(int(b_))
    pred_data = logits[np.array(time_idx), np.array(batch_idx)]    # [sum(lens), V]
    return pred_data, batch_sizes


# ----------------------------------------------------------------------------
# Deterministic parameter init (shapes follow Model.__init__)
# ----------------------------------------------------------------------------
def init_params(key, token_count, embedding_dim, hidden_dim, padding_code):
    ks = jax.random.split(key, 7)
    scale = 1.0 / np.sqrt(hidden_dim)
    emb = jax.random.normal(ks[0], (token_count, embedding_dim), jnp.float32) * 0.1
    emb = emb.at[padding_code].set(0.0)            # Embedding(padding_idx=...)
    # LSTM weights, transposed for x @ W, gate order (i, f, g, o)
    w_ih = jax.random.uniform(ks[1], (embedding_dim, 4 * hidden_dim),
                              jnp.float32, -scale, scale)
    w_hh = jax.random.uniform(ks[2], (hidden_dim, 4 * hidden_dim),
                              jnp.float32, -scale, scale)
    b_ih = jax.random.uniform(ks[3], (4 * hidden_dim,), jnp.float32, -scale, scale)
    b_hh = jax.random.uniform(ks[4], (4 * hidden_dim,), jnp.float32, -scale, scale)
    b = (b_ih + b_hh).reshape(1, 4 * hidden_dim)
    # dense head
    w_dense = jax.random.uniform(ks[5], (hidden_dim, token_count),
                                 jnp.float32, -scale, scale)
    b_dense = jax.random.uniform(ks[6], (token_count,),
                                 jnp.float32, -scale, scale).reshape(1, token_count)
    return dict(embedding=emb, w_ih=w_ih, w_hh=w_hh, b=b,
                w_dense=w_dense, b_dense=b_dense)


if __name__ == "__main__":
    # small shapes consistent with the module
    token_count = 16        # vocab (includes start/end/padding codes)
    embedding_dim = 16
    hidden_dim = 32
    batch = 3
    T_max = 8
    start_code, end_code, padding_code = 0, 1, token_count - 1

    key = jax.random.PRNGKey(0)
    kp, kt = jax.random.split(key)
    params = init_params(kp, token_count, embedding_dim, hidden_dim, padding_code)

    lens = np.array([8, 5, 3], dtype=np.int64)
    tunes = jax.random.randint(kt, (batch, T_max), 0, token_count - 1,
                               dtype=jnp.int32)
    # pad positions beyond each length with padding_code (like a real batch)
    col = np.arange(T_max)[None, :]
    pad_mask = jnp.asarray(col >= lens[:, None])
    tunes = jnp.where(pad_mask, padding_code, tunes)

    pred_data, batch_sizes = model_forward(tunes, lens, params)
    pred_data = jax.block_until_ready(pred_data)

    assert pred_data.shape == (int(lens.sum()), token_count)
    assert batch_sizes.shape == (T_max,)
    assert bool(jnp.all(jnp.isfinite(pred_data)))
    print("KERNEL_OK")
</pallas_src>

<mosaic_0001>
module attributes {stable_mosaic.version = 11 : i64} {
  func.func @lstm_chunk_kernel(%arg0: i32, %arg1: memref<64x128xf32, #tpu.memory_space<vmem>>, %arg2: memref<32x128xbf16, #tpu.memory_space<vmem>>, %arg3: memref<32x128xbf16, #tpu.memory_space<vmem>>, %arg4: memref<1x128xf32, #tpu.memory_space<vmem>>, %arg5: memref<64x128xbf16, #tpu.memory_space<vmem>>, %arg6: memref<8x32xf32, #tpu.memory_space<vmem>>, %arg7: memref<8x32xf32, #tpu.memory_space<vmem>>, %arg8: memref<64x32xf32, #tpu.memory_space<vmem>>) attributes {dimension_semantics = [#tpu.dimension_semantics<arbitrary>], iteration_bounds = array<i64: 1>, scalar_prefetch = 0 : i64, scratch_operands = 3 : i64, tpu.core_type = #tpu.core_type<tc>, window_params = [{transform_indices = @transform_0, window_bounds = array<i64: 64, 128>}, {pipeline_mode = #tpu.pipeline_mode<synchronous>, transform_indices = @transform_1, window_bounds = array<i64: 32, 128>}, {pipeline_mode = #tpu.pipeline_mode<synchronous>, transform_indices = @transform_2, window_bounds = array<i64: 32, 128>}, {pipeline_mode = #tpu.pipeline_mode<synchronous>, transform_indices = @transform_3, window_bounds = array<i64: 1, 128>}, {transform_indices = @transform_4, window_bounds = array<i64: 64, 128>}]} {
    %c0_i32 = arith.constant 0 : i32
    %0 = arith.cmpi eq, %arg0, %c0_i32 : i32
    %1 = arith.extui %0 : i1 to i32
    %c0_i32_0 = arith.constant 0 : i32
    %2 = arith.cmpi ne, %1, %c0_i32_0 : i32
    scf.if %2 {
      %cst_129 = arith.constant 0.000000e+00 : f32
      %244 = vector.broadcast %cst_129 : f32 to vector<8x32xf32>
      %c0_130 = arith.constant 0 : index
      %c0_131 = arith.constant 0 : index
      %245 = vector.load %arg6[%c0_130, %c0_131] : memref<8x32xf32, #tpu.memory_space<vmem>>, vector<8x32xf32>
      tpu.vector_store %arg6[%c0_130, %c0_131], %244 {strides = array<i32>} : memref<8x32xf32, #tpu.memory_space<vmem>>, vector<8x32xf32>,
      %cst_132 = arith.constant 0.000000e+00 : f32
      %246 = vector.broadcast %cst_132 : f32 to vector<8x32xf32>
      %c0_133 = arith.constant 0 : index
      %c0_134 = arith.constant 0 : index
      %247 = vector.load %arg7[%c0_133, %c0_134] : memref<8x32xf32, #tpu.memory_space<vmem>>, vector<8x32xf32>
      tpu.vector_store %arg7[%c0_133, %c0_134], %246 {strides = array<i32>} : memref<8x32xf32, #tpu.memory_space<vmem>>, vector<8x32xf32>,
    } else {
    }
    %c0_i32_1 = arith.constant 0 : i32
    %c8_i32 = arith.constant 8 : i32
    %3 = arith.muli %c0_i32_1, %c8_i32 : i32
    %4 = tpu.assume_multiple %3, 8 : i32
    %5 = arith.index_cast %4 : i32 to index
    %c0 = arith.constant 0 : index
    %6 = vector.load %arg1[%5, %c0] : memref<64x128xf32, #tpu.memory_space<vmem>>, vector<8x128xf32>
    %c0_2 = arith.constant 0 : index
    %c0_3 = arith.constant 0 : index
    %7 = vector.load %arg6[%c0_2, %c0_3] : memref<8x32xf32, #tpu.memory_space<vmem>>, vector<8x32xf32>
    %8 = arith.truncf %7 : vector<8x32xf32> to vector<8x32xbf16>
    %c0_4 = arith.constant 0 : index
    %c0_5 = arith.constant 0 : index
    %9 = vector.load %arg2[%c0_4, %c0_5] : memref<32x128xbf16, #tpu.memory_space<vmem>>, vector<32x128xbf16>
    %cst = arith.constant dense<0.000000e+00> : vector<8x128xf32>
    %10 = tpu.matmul %8, %9, %cst {dimension_numbers = #tpu.dot_dimension_numbers<[1], [0], [0], [1], [0, 0, 1, 1], [], []>} : vector<8x32xbf16>, vector<32x128xbf16>, vector<8x128xf32> -> vector<8x128xf32>
    %11 = arith.addf %6, %10 : vector<8x128xf32>
    %12 = arith.negf %11 : vector<8x128xf32>
    %13 = math.exp %12 : vector<8x128xf32>
    %cst_6 = arith.constant 1.000000e+00 : f32
    %14 = vector.broadcast %cst_6 : f32 to vector<8x128xf32>
    %15 = arith.addf %14, %13 : vector<8x128xf32>
    %16 = arith.divf %14, %15 : vector<8x128xf32>
    %17 = math.tanh %11 : vector<8x128xf32>
    %18 = vector.extract_strided_slice %16 {offsets = [0, 0], sizes = [8, 32], strides = [1, 1]} : vector<8x128xf32> to vector<8x32xf32>
    %19 = vector.extract_strided_slice %16 {offsets = [0, 32], sizes = [8, 32], strides = [1, 1]} : vector<8x128xf32> to vector<8x32xf32>
    %20 = vector.extract_strided_slice %17 {offsets = [0, 64], sizes = [8, 32], strides = [1, 1]} : vector<8x128xf32> to vector<8x32xf32>
    %21 = vector.extract_strided_slice %16 {offsets = [0, 96], sizes = [8, 32], strides = [1, 1]} : vector<8x128xf32> to vector<8x32xf32>
    %c0_7 = arith.constant 0 : index
    %c0_8 = arith.constant 0 : index
    %22 = vector.load %arg7[%c0_7, %c0_8] : memref<8x32xf32, #tpu.memory_space<vmem>>, vector<8x32xf32>
    %23 = arith.mulf %19, %22 : vector<8x32xf32>
    %24 = arith.mulf %18, %20 : vector<8x32xf32>
    %25 = arith.addf %23, %24 : vector<8x32xf32>
    %26 = math.tanh %25 : vector<8x32xf32>
    %27 = arith.mulf %21, %26 : vector<8x32xf32>
    %c0_9 = arith.constant 0 : index
    %c0_10 = arith.constant 0 : index
    %28 = vector.load %arg7[%c0_9, %c0_10] : memref<8x32xf32, #tpu.memory_space<vmem>>, vector<8x32xf32>
    tpu.vector_store %arg7[%c0_9, %c0_10], %25 {strides = array<i32>} : memref<8x32xf32, #tpu.memory_space<vmem>>, vector<8x32xf32>,
    %c0_11 = arith.constant 0 : index
    %c0_12 = arith.constant 0 : index
    %29 = vector.load %arg6[%c0_11, %c0_12] : memref<8x32xf32, #tpu.memory_space<vmem>>, vector<8x32xf32>
    tpu.vector_store %arg6[%c0_11, %c0_12], %27 {strides = array<i32>} : memref<8x32xf32, #tpu.memory_space<vmem>>, vector<8x32xf32>,
    %30 = arith.index_cast %4 : i32 to index
    %c0_13 = arith.constant 0 : index
    %31 = vector.load %arg8[%30, %c0_13] : memref<64x32xf32, #tpu.memory_space<vmem>>, vector<8x32xf32>
    tpu.vector_store %arg8[%30, %c0_13], %27 {strides = array<i32>} : memref<64x32xf32, #tpu.memory_space<vmem>>, vector<8x32xf32>,
    %c1_i32 = arith.constant 1 : i32
    %c8_i32_14 = arith.constant 8 : i32
    %32 = arith.muli %c1_i32, %c8_i32_14 : i32
    %33 = tpu.assume_multiple %32, 8 : i32
    %34 = arith.index_cast %33 : i32 to index
    %c0_15 = arith.constant 0 : index
    %35 = vector.load %arg1[%34, %c0_15] : memref<64x128xf32, #tpu.memory_space<vmem>>, vector<8x128xf32>
    %c0_16 = arith.constant 0 : index
    %c0_17 = arith.constant 0 : index
    %36 = vector.load %arg6[%c0_16, %c0_17] : memref<8x32xf32, #tpu.memory_space<vmem>>, vector<8x32xf32>
    %37 = arith.truncf %36 : vector<8x32xf32> to vector<8x32xbf16>
    %c0_18 = arith.constant 0 : index
    %c0_19 = arith.constant 0 : index
    %38 = vector.load %arg2[%c0_18, %c0_19] : memref<32x128xbf16, #tpu.memory_space<vmem>>, vector<32x128xbf16>
    %cst_20 = arith.constant dense<0.000000e+00> : vector<8x128xf32>
    %39 = tpu.matmul %37, %38, %cst_20 {dimension_numbers = #tpu.dot_dimension_numbers<[1], [0], [0], [1], [0, 0, 1, 1], [], []>} : vector<8x32xbf16>, vector<32x128xbf16>, vector<8x128xf32> -> vector<8x128xf32>
    %40 = arith.addf %35, %39 : vector<8x128xf32>
    %41 = arith.negf %40 : vector<8x128xf32>
    %42 = math.exp %41 : vector<8x128xf32>
    %cst_21 = arith.constant 1.000000e+00 : f32
    %43 = vector.broadcast %cst_21 : f32 to vector<8x128xf32>
    %44 = arith.addf %43, %42 : vector<8x128xf32>
    %45 = arith.divf %43, %44 : vector<8x128xf32>
    %46 = math.tanh %40 : vector<8x128xf32>
    %47 = vector.extract_strided_slice %45 {offsets = [0, 0], sizes = [8, 32], strides = [1, 1]} : vector<8x128xf32> to vector<8x32xf32>
    %48 = vector.extract_strided_slice %45 {offsets = [0, 32], sizes = [8, 32], strides = [1, 1]} : vector<8x128xf32> to vector<8x32xf32>
    %49 = vector.extract_strided_slice %46 {offsets = [0, 64], sizes = [8, 32], strides = [1, 1]} : vector<8x128xf32> to vector<8x32xf32>
    %50 = vector.extract_strided_slice %45 {offsets = [0, 96], sizes = [8, 32], strides = [1, 1]} : vector<8x128xf32> to vector<8x32xf32>
    %c0_22 = arith.constant 0 : index
    %c0_23 = arith.constant 0 : index
    %51 = vector.load %arg7[%c0_22, %c0_23] : memref<8x32xf32, #tpu.memory_space<vmem>>, vector<8x32xf32>
    %52 = arith.mulf %48, %51 : vector<8x32xf32>
    %53 = arith.mulf %47, %49 : vector<8x32xf32>
    %54 = arith.addf %52, %53 : vector<8x32xf32>
    %55 = math.tanh %54 : vector<8x32xf32>
    %56 = arith.mulf %50, %55 : vector<8x32xf32>
    %c0_24 = arith.constant 0 : index
    %c0_25 = arith.constant 0 : index
    %57 = vector.load %arg7[%c0_24, %c0_25] : memref<8x32xf32, #tpu.memory_space<vmem>>, vector<8x32xf32>
    tpu.vector_store %arg7[%c0_24, %c0_25], %54 {strides = array<i32>} : memref<8x32xf32, #tpu.memory_space<vmem>>, vector<8x32xf32>,
    %c0_26 = arith.constant 0 : index
    %c0_27 = arith.constant 0 : index
    %58 = vector.load %arg6[%c0_26, %c0_27] : memref<8x32xf32, #tpu.memory_space<vmem>>, vector<8x32xf32>
    tpu.vector_store %arg6[%c0_26, %c0_27], %56 {strides = array<i32>} : memref<8x32xf32, #tpu.memory_space<vmem>>, vector<8x32xf32>,
    %59 = arith.index_cast %33 : i32 to index
    %c0_28 = arith.constant 0 : index
    %60 = vector.load %arg8[%59, %c0_28] : memref<64x32xf32, #tpu.memory_space<vmem>>, vector<8x32xf32>
    tpu.vector_store %arg8[%59, %c0_28], %56 {strides = array<i32>} : memref<64x32xf32, #tpu.memory_space<vmem>>, vector<8x32xf32>,
    %c2_i32 = arith.constant 2 : i32
    %c8_i32_29 = arith.constant 8 : i32
    %61 = arith.muli %c2_i32, %c8_i32_29 : i32
    %62 = tpu.assume_multiple %61, 8 : i32
    %63 = arith.index_cast %62 : i32 to index
    %c0_30 = arith.constant 0 : index
    %64 = vector.load %arg1[%63, %c0_30] : memref<64x128xf32, #tpu.memory_space<vmem>>, vector<8x128xf32>
    %c0_31 = arith.constant 0 : index
    %c0_32 = arith.constant 0 : index
    %65 = vector.load %arg6[%c0_31, %c0_32] : memref<8x32xf32, #tpu.memory_space<vmem>>, vector<8x32xf32>
    %66 = arith.truncf %65 : vector<8x32xf32> to vector<8x32xbf16>
    %c0_33 = arith.constant 0 : index
    %c0_34 = arith.constant 0 : index
    %67 = vector.load %arg2[%c0_33, %c0_34] : memref<32x128xbf16, #tpu.memory_space<vmem>>, vector<32x128xbf16>
    %cst_35 = arith.constant dense<0.000000e+00> : vector<8x128xf32>
    %68 = tpu.matmul %66, %67, %cst_35 {dimension_numbers = #tpu.dot_dimension_numbers<[1], [0], [0], [1], [0, 0, 1, 1], [], []>} : vector<8x32xbf16>, vector<32x128xbf16>, vector<8x128xf32> -> vector<8x128xf32>
    %69 = arith.addf %64, %68 : vector<8x128xf32>
    %70 = arith.negf %69 : vector<8x128xf32>
    %71 = math.exp %70 : vector<8x128xf32>
    %cst_36 = arith.constant 1.000000e+00 : f32
    %72 = vector.broadcast %cst_36 : f32 to vector<8x128xf32>
    %73 = arith.addf %72, %71 : vector<8x128xf32>
    %74 = arith.divf %72, %73 : vector<8x128xf32>
    %75 = math.tanh %69 : vector<8x128xf32>
    %76 = vector.extract_strided_slice %74 {offsets = [0, 0], sizes = [8, 32], strides = [1, 1]} : vector<8x128xf32> to vector<8x32xf32>
    %77 = vector.extract_strided_slice %74 {offsets = [0, 32], sizes = [8, 32], strides = [1, 1]} : vector<8x128xf32> to vector<8x32xf32>
    %78 = vector.extract_strided_slice %75 {offsets = [0, 64], sizes = [8, 32], strides = [1, 1]} : vector<8x128xf32> to vector<8x32xf32>
    %79 = vector.extract_strided_slice %74 {offsets = [0, 96], sizes = [8, 32], strides = [1, 1]} : vector<8x128xf32> to vector<8x32xf32>
    %c0_37 = arith.constant 0 : index
    %c0_38 = arith.constant 0 : index
    %80 = vector.load %arg7[%c0_37, %c0_38] : memref<8x32xf32, #tpu.memory_space<vmem>>, vector<8x32xf32>
    %81 = arith.mulf %77, %80 : vector<8x32xf32>
    %82 = arith.mulf %76, %78 : vector<8x32xf32>
    %83 = arith.addf %81, %82 : vector<8x32xf32>
    %84 = math.tanh %83 : vector<8x32xf32>
    %85 = arith.mulf %79, %84 : vector<8x32xf32>
    %c0_39 = arith.constant 0 : index
    %c0_40 = arith.constant 0 : index
    %86 = vector.load %arg7[%c0_39, %c0_40] : memref<8x32xf32, #tpu.memory_space<vmem>>, vector<8x32xf32>
    tpu.vector_store %arg7[%c0_39, %c0_40], %83 {strides = array<i32>} : memref<8x32xf32, #tpu.memory_space<vmem>>, vector<8x32xf32>,
    %c0_41 = arith.constant 0 : index
    %c0_42 = arith.constant 0 : index
    %87 = vector.load %arg6[%c0_41, %c0_42] : memref<8x32xf32, #tpu.memory_space<vmem>>, vector<8x32xf32>
    tpu.vector_store %arg6[%c0_41, %c0_42], %85 {strides = array<i32>} : memref<8x32xf32, #tpu.memory_space<vmem>>, vector<8x32xf32>,
    %88 = arith.index_cast %62 : i32 to index
    %c0_43 = arith.constant 0 : index
    %89 = vector.load %arg8[%88, %c0_43] : memref<64x32xf32, #tpu.memory_space<vmem>>, vector<8x32xf32>
    tpu.vector_store %arg8[%88, %c0_43], %85 {strides = array<i32>} : memref<64x32xf32, #tpu.memory_space<vmem>>, vector<8x32xf32>,
    %c3_i32 = arith.constant 3 : i32
    %c8_i32_44 = arith.constant 8 : i32
    %90 = arith.muli %c3_i32, %c8_i32_44 : i32
    %91 = tpu.assume_multiple %90, 8 : i32
    %92 = arith.index_cast %91 : i32 to index
    %c0_45 = arith.constant 0 : index
    %93 = vector.load %arg1[%92, %c0_45] : memref<64x128xf32, #tpu.memory_space<vmem>>, vector<8x128xf32>
    %c0_46 = arith.constant 0 : index
    %c0_47 = arith.constant 0 : index
    %94 = vector.load %arg6[%c0_46, %c0_47] : memref<8x32xf32, #tpu.memory_space<vmem>>, vector<8x32xf32>
    %95 = arith.truncf %94 : vector<8x32xf32> to vector<8x32xbf16>
    %c0_48 = arith.constant 0 : index
    %c0_49 = arith.constant 0 : index
    %96 = vector.load %arg2[%c0_48, %c0_49] : memref<32x128xbf16, #tpu.memory_space<vmem>>, vector<32x128xbf16>
    %cst_50 = arith.constant dense<0.000000e+00> : vector<8x128xf32>
    %97 = tpu.matmul %95, %96, %cst_50 {dimension_numbers = #tpu.dot_dimension_numbers<[1], [0], [0], [1], [0, 0, 1, 1], [], []>} : vector<8x32xbf16>, vector<32x128xbf16>, vector<8x128xf32> -> vector<8x128xf32>
    %98 = arith.addf %93, %97 : vector<8x128xf32>
    %99 = arith.negf %98 : vector<8x128xf32>
    %100 = math.exp %99 : vector<8x128xf32>
    %cst_51 = arith.constant 1.000000e+00 : f32
    %101 = vector.broadcast %cst_51 : f32 to vector<8x128xf32>
    %102 = arith.addf %101, %100 : vector<8x128xf32>
    %103 = arith.divf %101, %102 : vector<8x128xf32>
    %104 = math.tanh %98 : vector<8x128xf32>
    %105 = vector.extract_strided_slice %103 {offsets = [0, 0], sizes = [8, 32], strides = [1, 1]} : vector<8x128xf32> to vector<8x32xf32>
    %106 = vector.extract_strided_slice %103 {offsets = [0, 32], sizes = [8, 32], strides = [1, 1]} : vector<8x128xf32> to vector<8x32xf32>
    %107 = vector.extract_strided_slice %104 {offsets = [0, 64], sizes = [8, 32], strides = [1, 1]} : vector<8x128xf32> to vector<8x32xf32>
    %108 = vector.extract_strided_slice %103 {offsets = [0, 96], sizes = [8, 32], strides = [1, 1]} : vector<8x128xf32> to vector<8x32xf32>
    %c0_52 = arith.constant 0 : index
    %c0_53 = arith.constant 0 : index
    %109 = vector.load %arg7[%c0_52, %c0_53] : memref<8x32xf32, #tpu.memory_space<vmem>>, vector<8x32xf32>
    %110 = arith.mulf %106, %109 : vector<8x32xf32>
    %111 = arith.mulf %105, %107 : vector<8x32xf32>
    %112 = arith.addf %110, %111 : vector<8x32xf32>
    %113 = math.tanh %112 : vector<8x32xf32>
    %114 = arith.mulf %108, %113 : vector<8x32xf32>
    %c0_54 = arith.constant 0 : index
    %c0_55 = arith.constant 0 : index
    %115 = vector.load %arg7[%c0_54, %c0_55] : memref<8x32xf32, #tpu.memory_space<vmem>>, vector<8x32xf32>
    tpu.vector_store %arg7[%c0_54, %c0_55], %112 {strides = array<i32>} : memref<8x32xf32, #tpu.memory_space<vmem>>, vector<8x32xf32>,
    %c0_56 = arith.constant 0 : index
    %c0_57 = arith.constant 0 : index
    %116 = vector.load %arg6[%c0_56, %c0_57] : memref<8x32xf32, #tpu.memory_space<vmem>>, vector<8x32xf32>
    tpu.vector_store %arg6[%c0_56, %c0_57], %114 {strides = array<i32>} : memref<8x32xf32, #tpu.memory_space<vmem>>, vector<8x32xf32>,
    %117 = arith.index_cast %91 : i32 to index
    %c0_58 = arith.constant 0 : index
    %118 = vector.load %arg8[%117, %c0_58] : memref<64x32xf32, #tpu.memory_space<vmem>>, vector<8x32xf32>
    tpu.vector_store %arg8[%117, %c0_58], %114 {strides = array<i32>} : memref<64x32xf32, #tpu.memory_space<vmem>>, vector<8x32xf32>,
    %c4_i32 = arith.constant 4 : i32
    %c8_i32_59 = arith.constant 8 : i32
    %119 = arith.muli %c4_i32, %c8_i32_59 : i32
    %120 = tpu.assume_multiple %119, 8 : i32
    %121 = arith.index_cast %120 : i32 to index
    %c0_60 = arith.constant 0 : index
    %122 = vector.load %arg1[%121, %c0_60] : memref<64x128xf32, #tpu.memory_space<vmem>>, vector<8x128xf32>
    %c0_61 = arith.constant 0 : index
    %c0_62 = arith.constant 0 : index
    %123 = vector.load %arg6[%c0_61, %c0_62] : memref<8x32xf32, #tpu.memory_space<vmem>>, vector<8x32xf32>
    %124 = arith.truncf %123 : vector<8x32xf32> to vector<8x32xbf16>
    %c0_63 = arith.constant 0 : index
    %c0_64 = arith.constant 0 : index
    %125 = vector.load %arg2[%c0_63, %c0_64] : memref<32x128xbf16, #tpu.memory_space<vmem>>, vector<32x128xbf16>
    %cst_65 = arith.constant dense<0.000000e+00> : vector<8x128xf32>
    %126 = tpu.matmul %124, %125, %cst_65 {dimension_numbers = #tpu.dot_dimension_numbers<[1], [0], [0], [1], [0, 0, 1, 1], [], []>} : vector<8x32xbf16>, vector<32x128xbf16>, vector<8x128xf32> -> vector<8x128xf32>
    %127 = arith.addf %122, %126 : vector<8x128xf32>
    %128 = arith.negf %127 : vector<8x128xf32>
    %129 = math.exp %128 : vector<8x128xf32>
    %cst_66 = arith.constant 1.000000e+00 : f32
    %130 = vector.broadcast %cst_66 : f32 to vector<8x128xf32>
    %131 = arith.addf %130, %129 : vector<8x128xf32>
    %132 = arith.divf %130, %131 : vector<8x128xf32>
    %133 = math.tanh %127 : vector<8x128xf32>
    %134 = vector.extract_strided_slice %132 {offsets = [0, 0], sizes = [8, 32], strides = [1, 1]} : vector<8x128xf32> to vector<8x32xf32>
    %135 = vector.extract_strided_slice %132 {offsets = [0, 32], sizes = [8, 32], strides = [1, 1]} : vector<8x128xf32> to vector<8x32xf32>
    %136 = vector.extract_strided_slice %133 {offsets = [0, 64], sizes = [8, 32], strides = [1, 1]} : vector<8x128xf32> to vector<8x32xf32>
    %137 = vector.extract_strided_slice %132 {offsets = [0, 96], sizes = [8, 32], strides = [1, 1]} : vector<8x128xf32> to vector<8x32xf32>
    %c0_67 = arith.constant 0 : index
    %c0_68 = arith.constant 0 : index
    %138 = vector.load %arg7[%c0_67, %c0_68] : memref<8x32xf32, #tpu.memory_space<vmem>>, vector<8x32xf32>
    %139 = arith.mulf %135, %138 : vector<8x32xf32>
    %140 = arith.mulf %134, %136 : vector<8x32xf32>
    %141 = arith.addf %139, %140 : vector<8x32xf32>
    %142 = math.tanh %141 : vector<8x32xf32>
    %143 = arith.mulf %137, %142 : vector<8x32xf32>
    %c0_69 = arith.constant 0 : index
    %c0_70 = arith.constant 0 : index
    %144 = vector.load %arg7[%c0_69, %c0_70] : memref<8x32xf32, #tpu.memory_space<vmem>>, vector<8x32xf32>
    tpu.vector_store %arg7[%c0_69, %c0_70], %141 {strides = array<i32>} : memref<8x32xf32, #tpu.memory_space<vmem>>, vector<8x32xf32>,
    %c0_71 = arith.constant 0 : index
    %c0_72 = arith.constant 0 : index
    %145 = vector.load %arg6[%c0_71, %c0_72] : memref<8x32xf32, #tpu.memory_space<vmem>>, vector<8x32xf32>
    tpu.vector_store %arg6[%c0_71, %c0_72], %143 {strides = array<i32>} : memref<8x32xf32, #tpu.memory_space<vmem>>, vector<8x32xf32>,
    %146 = arith.index_cast %120 : i32 to index
    %c0_73 = arith.constant 0 : index
    %147 = vector.load %arg8[%146, %c0_73] : memref<64x32xf32, #tpu.memory_space<vmem>>, vector<8x32xf32>
    tpu.vector_store %arg8[%146, %c0_73], %143 {strides = array<i32>} : memref<64x32xf32, #tpu.memory_space<vmem>>, vector<8x32xf32>,
    %c5_i32 = arith.constant 5 : i32
    %c8_i32_74 = arith.constant 8 : i32
    %148 = arith.muli %c5_i32, %c8_i32_74 : i32
    %149 = tpu.assume_multiple %148, 8 : i32
    %150 = arith.index_cast %149 : i32 to index
    %c0_75 = arith.constant 0 : index
    %151 = vector.load %arg1[%150, %c0_75] : memref<64x128xf32, #tpu.memory_space<vmem>>, vector<8x128xf32>
    %c0_76 = arith.constant 0 : index
    %c0_77 = arith.constant 0 : index
    %152 = vector.load %arg6[%c0_76, %c0_77] : memref<8x32xf32, #tpu.memory_space<vmem>>, vector<8x32xf32>
    %153 = arith.truncf %152 : vector<8x32xf32> to vector<8x32xbf16>
    %c0_78 = arith.constant 0 : index
    %c0_79 = arith.constant 0 : index
    %154 = vector.load %arg2[%c0_78, %c0_79] : memref<32x128xbf16, #tpu.memory_space<vmem>>, vector<32x128xbf16>
    %cst_80 = arith.constant dense<0.000000e+00> : vector<8x128xf32>
    %155 = tpu.matmul %153, %154, %cst_80 {dimension_numbers = #tpu.dot_dimension_numbers<[1], [0], [0], [1], [0, 0, 1, 1], [], []>} : vector<8x32xbf16>, vector<32x128xbf16>, vector<8x128xf32> -> vector<8x128xf32>
    %156 = arith.addf %151, %155 : vector<8x128xf32>
    %157 = arith.negf %156 : vector<8x128xf32>
    %158 = math.exp %157 : vector<8x128xf32>
    %cst_81 = arith.constant 1.000000e+00 : f32
    %159 = vector.broadcast %cst_81 : f32 to vector<8x128xf32>
    %160 = arith.addf %159, %158 : vector<8x128xf32>
    %161 = arith.divf %159, %160 : vector<8x128xf32>
    %162 = math.tanh %156 : vector<8x128xf32>
    %163 = vector.extract_strided_slice %161 {offsets = [0, 0], sizes = [8, 32], strides = [1, 1]} : vector<8x128xf32> to vector<8x32xf32>
    %164 = vector.extract_strided_slice %161 {offsets = [0, 32], sizes = [8, 32], strides = [1, 1]} : vector<8x128xf32> to vector<8x32xf32>
    %165 = vector.extract_strided_slice %162 {offsets = [0, 64], sizes = [8, 32], strides = [1, 1]} : vector<8x128xf32> to vector<8x32xf32>
    %166 = vector.extract_strided_slice %161 {offsets = [0, 96], sizes = [8, 32], strides = [1, 1]} : vector<8x128xf32> to vector<8x32xf32>
    %c0_82 = arith.constant 0 : index
    %c0_83 = arith.constant 0 : index
    %167 = vector.load %arg7[%c0_82, %c0_83] : memref<8x32xf32, #tpu.memory_space<vmem>>, vector<8x32xf32>
    %168 = arith.mulf %164, %167 : vector<8x32xf32>
    %169 = arith.mulf %163, %165 : vector<8x32xf32>
    %170 = arith.addf %168, %169 : vector<8x32xf32>
    %171 = math.tanh %170 : vector<8x32xf32>
    %172 = arith.mulf %166, %171 : vector<8x32xf32>
    %c0_84 = arith.constant 0 : index
    %c0_85 = arith.constant 0 : index
    %173 = vector.load %arg7[%c0_84, %c0_85] : memref<8x32xf32, #tpu.memory_space<vmem>>, vector<8x32xf32>
    tpu.vector_store %arg7[%c0_84, %c0_85], %170 {strides = array<i32>} : memref<8x32xf32, #tpu.memory_space<vmem>>, vector<8x32xf32>,
    %c0_86 = arith.constant 0 : index
    %c0_87 = arith.constant 0 : index
    %174 = vector.load %arg6[%c0_86, %c0_87] : memref<8x32xf32, #tpu.memory_space<vmem>>, vector<8x32xf32>
    tpu.vector_store %arg6[%c0_86, %c0_87], %172 {strides = array<i32>} : memref<8x32xf32, #tpu.memory_space<vmem>>, vector<8x32xf32>,
    %175 = arith.index_cast %149 : i32 to index
    %c0_88 = arith.constant 0 : index
    %176 = vector.load %arg8[%175, %c0_88] : memref<64x32xf32, #tpu.memory_space<vmem>>, vector<8x32xf32>
    tpu.vector_store %arg8[%175, %c0_88], %172 {strides = array<i32>} : memref<64x32xf32, #tpu.memory_space<vmem>>, vector<8x32xf32>,
    %c6_i32 = arith.constant 6 : i32
    %c8_i32_89 = arith.constant 8 : i32
    %177 = arith.muli %c6_i32, %c8_i32_89 : i32
    %178 = tpu.assume_multiple %177, 8 : i32
    %179 = arith.index_cast %178 : i32 to index
    %c0_90 = arith.constant 0 : index
    %180 = vector.load %arg1[%179, %c0_90] : memref<64x128xf32, #tpu.memory_space<vmem>>, vector<8x128xf32>
    %c0_91 = arith.constant 0 : index
    %c0_92 = arith.constant 0 : index
    %181 = vector.load %arg6[%c0_91, %c0_92] : memref<8x32xf32, #tpu.memory_space<vmem>>, vector<8x32xf32>
    %182 = arith.truncf %181 : vector<8x32xf32> to vector<8x32xbf16>
    %c0_93 = arith.constant 0 : index
    %c0_94 = arith.constant 0 : index
    %183 = vector.load %arg2[%c0_93, %c0_94] : memref<32x128xbf16, #tpu.memory_space<vmem>>, vector<32x128xbf16>
    %cst_95 = arith.constant dense<0.000000e+00> : vector<8x128xf32>
    %184 = tpu.matmul %182, %183, %cst_95 {dimension_numbers = #tpu.dot_dimension_numbers<[1], [0], [0], [1], [0, 0, 1, 1], [], []>} : vector<8x32xbf16>, vector<32x128xbf16>, vector<8x128xf32> -> vector<8x128xf32>
    %185 = arith.addf %180, %184 : vector<8x128xf32>
    %186 = arith.negf %185 : vector<8x128xf32>
    %187 = math.exp %186 : vector<8x128xf32>
    %cst_96 = arith.constant 1.000000e+00 : f32
    %188 = vector.broadcast %cst_96 : f32 to vector<8x128xf32>
    %189 = arith.addf %188, %187 : vector<8x128xf32>
    %190 = arith.divf %188, %189 : vector<8x128xf32>
    %191 = math.tanh %185 : vector<8x128xf32>
    %192 = vector.extract_strided_slice %190 {offsets = [0, 0], sizes = [8, 32], strides = [1, 1]} : vector<8x128xf32> to vector<8x32xf32>
    %193 = vector.extract_strided_slice %190 {offsets = [0, 32], sizes = [8, 32], strides = [1, 1]} : vector<8x128xf32> to vector<8x32xf32>
    %194 = vector.extract_strided_slice %191 {offsets = [0, 64], sizes = [8, 32], strides = [1, 1]} : vector<8x128xf32> to vector<8x32xf32>
    %195 = vector.extract_strided_slice %190 {offsets = [0, 96], sizes = [8, 32], strides = [1, 1]} : vector<8x128xf32> to vector<8x32xf32>
    %c0_97 = arith.constant 0 : index
    %c0_98 = arith.constant 0 : index
    %196 = vector.load %arg7[%c0_97, %c0_98] : memref<8x32xf32, #tpu.memory_space<vmem>>, vector<8x32xf32>
    %197 = arith.mulf %193, %196 : vector<8x32xf32>
    %198 = arith.mulf %192, %194 : vector<8x32xf32>
    %199 = arith.addf %197, %198 : vector<8x32xf32>
    %200 = math.tanh %199 : vector<8x32xf32>
    %201 = arith.mulf %195, %200 : vector<8x32xf32>
    %c0_99 = arith.constant 0 : index
    %c0_100 = arith.constant 0 : index
    %202 = vector.load %arg7[%c0_99, %c0_100] : memref<8x32xf32, #tpu.memory_space<vmem>>, vector<8x32xf32>
    tpu.vector_store %arg7[%c0_99, %c0_100], %199 {strides = array<i32>} : memref<8x32xf32, #tpu.memory_space<vmem>>, vector<8x32xf32>,
    %c0_101 = arith.constant 0 : index
    %c0_102 = arith.constant 0 : index
    %203 = vector.load %arg6[%c0_101, %c0_102] : memref<8x32xf32, #tpu.memory_space<vmem>>, vector<8x32xf32>
    tpu.vector_store %arg6[%c0_101, %c0_102], %201 {strides = array<i32>} : memref<8x32xf32, #tpu.memory_space<vmem>>, vector<8x32xf32>,
    %204 = arith.index_cast %178 : i32 to index
    %c0_103 = arith.constant 0 : index
    %205 = vector.load %arg8[%204, %c0_103] : memref<64x32xf32, #tpu.memory_space<vmem>>, vector<8x32xf32>
    tpu.vector_store %arg8[%204, %c0_103], %201 {strides = array<i32>} : memref<64x32xf32, #tpu.memory_space<vmem>>, vector<8x32xf32>,
    %c7_i32 = arith.constant 7 : i32
    %c8_i32_104 = arith.constant 8 : i32
    %206 = arith.muli %c7_i32, %c8_i32_104 : i32
    %207 = tpu.assume_multiple %206, 8 : i32
    %208 = arith.index_cast %207 : i32 to index
    %c0_105 = arith.constant 0 : index
    %209 = vector.load %arg1[%208, %c0_105] : memref<64x128xf32, #tpu.memory_space<vmem>>, vector<8x128xf32>
    %c0_106 = arith.constant 0 : index
    %c0_107 = arith.constant 0 : index
    %210 = vector.load %arg6[%c0_106, %c0_107] : memref<8x32xf32, #tpu.memory_space<vmem>>, vector<8x32xf32>
    %211 = arith.truncf %210 : vector<8x32xf32> to vector<8x32xbf16>
    %c0_108 = arith.constant 0 : index
    %c0_109 = arith.constant 0 : index
    %212 = vector.load %arg2[%c0_108, %c0_109] : memref<32x128xbf16, #tpu.memory_space<vmem>>, vector<32x128xbf16>
    %cst_110 = arith.constant dense<0.000000e+00> : vector<8x128xf32>
    %213 = tpu.matmul %211, %212, %cst_110 {dimension_numbers = #tpu.dot_dimension_numbers<[1], [0], [0], [1], [0, 0, 1, 1], [], []>} : vector<8x32xbf16>, vector<32x128xbf16>, vector<8x128xf32> -> vector<8x128xf32>
    %214 = arith.addf %209, %213 : vector<8x128xf32>
    %215 = arith.negf %214 : vector<8x128xf32>
    %216 = math.exp %215 : vector<8x128xf32>
    %cst_111 = arith.constant 1.000000e+00 : f32
    %217 = vector.broadcast %cst_111 : f32 to vector<8x128xf32>
    %218 = arith.addf %217, %216 : vector<8x128xf32>
    %219 = arith.divf %217, %218 : vector<8x128xf32>
    %220 = math.tanh %214 : vector<8x128xf32>
    %221 = vector.extract_strided_slice %219 {offsets = [0, 0], sizes = [8, 32], strides = [1, 1]} : vector<8x128xf32> to vector<8x32xf32>
    %222 = vector.extract_strided_slice %219 {offsets = [0, 32], sizes = [8, 32], strides = [1, 1]} : vector<8x128xf32> to vector<8x32xf32>
    %223 = vector.extract_strided_slice %220 {offsets = [0, 64], sizes = [8, 32], strides = [1, 1]} : vector<8x128xf32> to vector<8x32xf32>
    %224 = vector.extract_strided_slice %219 {offsets = [0, 96], sizes = [8, 32], strides = [1, 1]} : vector<8x128xf32> to vector<8x32xf32>
    %c0_112 = arith.constant 0 : index
    %c0_113 = arith.constant 0 : index
    %225 = vector.load %arg7[%c0_112, %c0_113] : memref<8x32xf32, #tpu.memory_space<vmem>>, vector<8x32xf32>
    %226 = arith.mulf %222, %225 : vector<8x32xf32>
    %227 = arith.mulf %221, %223 : vector<8x32xf32>
    %228 = arith.addf %226, %227 : vector<8x32xf32>
    %229 = math.tanh %228 : vector<8x32xf32>
    %230 = arith.mulf %224, %229 : vector<8x32xf32>
    %c0_114 = arith.constant 0 : index
    %c0_115 = arith.constant 0 : index
    %231 = vector.load %arg7[%c0_114, %c0_115] : memref<8x32xf32, #tpu.memory_space<vmem>>, vector<8x32xf32>
    tpu.vector_store %arg7[%c0_114, %c0_115], %228 {strides = array<i32>} : memref<8x32xf32, #tpu.memory_space<vmem>>, vector<8x32xf32>,
    %c0_116 = arith.constant 0 : index
    %c0_117 = arith.constant 0 : index
    %232 = vector.load %arg6[%c0_116, %c0_117] : memref<8x32xf32, #tpu.memory_space<vmem>>, vector<8x32xf32>
    tpu.vector_store %arg6[%c0_116, %c0_117], %230 {strides = array<i32>} : memref<8x32xf32, #tpu.memory_space<vmem>>, vector<8x32xf32>,
    %233 = arith.index_cast %207 : i32 to index
    %c0_118 = arith.constant 0 : index
    %234 = vector.load %arg8[%233, %c0_118] : memref<64x32xf32, #tpu.memory_space<vmem>>, vector<8x32xf32>
    tpu.vector_store %arg8[%233, %c0_118], %230 {strides = array<i32>} : memref<64x32xf32, #tpu.memory_space<vmem>>, vector<8x32xf32>,
    %c8_i32_119 = arith.constant 8 : i32
    %c0_120 = arith.constant 0 : index
    %c0_121 = arith.constant 0 : index
    %235 = vector.load %arg8[%c0_120, %c0_121] : memref<64x32xf32, #tpu.memory_space<vmem>>, vector<64x32xf32>
    %236 = arith.truncf %235 : vector<64x32xf32> to vector<64x32xbf16>
    %c0_122 = arith.constant 0 : index
    %c0_123 = arith.constant 0 : index
    %237 = vector.load %arg3[%c0_122, %c0_123] : memref<32x128xbf16, #tpu.memory_space<vmem>>, vector<32x128xbf16>
    %cst_124 = arith.constant dense<0.000000e+00> : vector<64x128xf32>
    %238 = tpu.matmul %236, %237, %cst_124 {dimension_numbers = #tpu.dot_dimension_numbers<[1], [0], [0], [1], [0, 0, 1, 1], [], []>} : vector<64x32xbf16>, vector<32x128xbf16>, vector<64x128xf32> -> vector<64x128xf32>
    %c0_125 = arith.constant 0 : index
    %c0_126 = arith.constant 0 : index
    %239 = vector.load %arg4[%c0_125, %c0_126] : memref<1x128xf32, #tpu.memory_space<vmem>>, vector<1x128xf32>
    %240 = vector.broadcast %239 : vector<1x128xf32> to vector<64x128xf32>
    %241 = arith.addf %238, %240 : vector<64x128xf32>
    %242 = arith.truncf %241 : vector<64x128xf32> to vector<64x128xbf16>
    %c0_127 = arith.constant 0 : index
    %c0_128 = arith.constant 0 : index
    %243 = vector.load %arg5[%c0_127, %c0_128] : memref<64x128xbf16, #tpu.memory_space<vmem>>, vector<64x128xbf16>
    tpu.vector_store %arg5[%c0_127, %c0_128], %242 {strides = array<i32>} : memref<64x128xbf16, #tpu.memory_space<vmem>>, vector<64x128xbf16>,
    return
  }
  func.func @transform_0(%arg0: i32) -> (i32, i32) {
    %c0_i32 = arith.constant 0 : i32
    %c0_i32_0 = arith.constant 0 : i32
    return %arg0, %c0_i32 : i32, i32
  }
  func.func @transform_1(%arg0: i32) -> (i32, i32) {
    %c0_i32 = arith.constant 0 : i32
    %c0_i32_0 = arith.constant 0 : i32
    %c0_i32_1 = arith.constant 0 : i32
    return %c0_i32, %c0_i32_0 : i32, i32
  }
  func.func @transform_2(%arg0: i32) -> (i32, i32) {
    %c0_i32 = arith.constant 0 : i32
    %c0_i32_0 = arith.constant 0 : i32
    %c0_i32_1 = arith.constant 0 : i32
    return %c0_i32, %c0_i32_0 : i32, i32
  }
  func.func @transform_3(%arg0: i32) -> (i32, i32) {
    %c0_i32 = arith.constant 0 : i32
    %c0_i32_0 = arith.constant 0 : i32
    %c0_i32_1 = arith.constant 0 : i32
    return %c0_i32, %c0_i32_0 : i32, i32
  }
  func.func @transform_4(%arg0: i32) -> (i32, i32) {
    %c0_i32 = arith.constant 0 : i32
    %c0_i32_0 = arith.constant 0 : i32
    return %arg0, %c0_i32 : i32, i32
  }
}

</mosaic_0001>

<bundles_post_ra>
// kernel: tpu_custom_call.1
= control target key start
LH: loop header
LB: loop body
LE: loop exit
PB: predicated region body
PF: predicated region fallthrough
CT: control target
= control target key end

     0   :  { %9 = vsyncpa [#allocation6], 0  ;;  %s1675_s0 = inlined_call_operand.hbm [shape: f32[64,128], index: 0, kind: input, shape index: {}]   ;;  %s1676_s1 = inlined_call_operand.hbm [shape: bf16[32,128], index: 1, kind: input, shape index: {}]   ;;  %s1677_s2 = inlined_call_operand.hbm [shape: bf16[32,128], index: 2, kind: input, shape index: {}]   ;;  %s1678_s3 = inlined_call_operand.vmem [shape: f32[1,128], index: 3, kind: input, shape index: {}]   ;;  %s1679_s4 = inlined_call_operand.hbm [shape: bf16[64,128], index: 4, kind: output, shape index: {}]  }
   0x1   :  { %10 = vsyncpa [#allocation9], 0 }
   0x2   :  { %11 = vsyncpa [#allocation7], 0  ;;  %s1448_s15 = smov [#allocation8]   ;;  %s1354_s19 = scalar_lea.hbm %s1676_s1, 256 }
   0x3   :  { %s29_s16 = sshll.u32 %s1448_s15, 4  ;;  %p1355_p0 = scmp.ne.s32.totalorder %s1676_s1, %s1354_s19  ;;  %s30_s16 = int_to_ptr.vmem [resolvable:$true] %s29_s16 }
   0x4   :  { %p1358_p1 = scmp.lt.u32.totalorder %s1354_s19, %s1676_s1 }
   0x6   :  { %p1360_p2 = pnand %p1358_p1, %p1355_p0 }
   0x8   :  { %1363 = shalt.err (!%p1360_p2)
}
   0x9   :  { %s1364_s24 = scalar_lea.vmem %s30_s16, 256  ;;  %p1369_p4 = scmp.lt.s32.totalorder %s30_s16, %s30_s16 }
   0xa   :  { %p1365_p3 = scmp.ne.s32.totalorder %s30_s16, %s1364_s24  ;;  %p1370_p5 = scmp.lt.s32.totalorder %s1364_s24, %s1364_s24 }
   0xc   :  { %p1371_p6 = por %p1370_p5, %p1369_p4 }
   0xe   :  { %p1372_p7 = pnand %p1371_p6, %p1365_p3 }
  0x10   :  { %1375 = shalt.err (!%p1372_p7)
}
  0x11   :  { %s1449_s25 = smov 64   ;;  %s1450_s26 = smov 4  }
  0x12   :  { %35 = dma.hbm_to_vmem [thread:$0]  %s1676_s1, 256, %s30_s16, [#allocation9], %s1449_s25, %s1449_s25, %s1450_s26  }
  0x13   :  { %s1451_s29 = smov [#allocation5]   ;;  %s1376_s7 = scalar_lea.hbm %s1675_s0, 1024 }
  0x14   :  { %s17_s30 = sshll.u32 %s1451_s29, 4  ;;  %p1377_p8 = scmp.ne.s32.totalorder %s1675_s0, %s1376_s7  ;;  %s18_s30 = int_to_ptr.vmem [resolvable:$true] %s17_s30 }
  0x15   :  { %p1380_p9 = scmp.lt.u32.totalorder %s1376_s7, %s1675_s0 }
  0x17   :  { %p1382_p10 = pnand %p1380_p9, %p1377_p8 }
  0x19   :  { %1385 = shalt.err (!%p1382_p10)
}
  0x1a   :  { %s1386_s12 = scalar_lea.vmem %s18_s30, 1024  ;;  %p1391_p12 = scmp.lt.s32.totalorder %s18_s30, %s18_s30 }
  0x1b   :  { %p1387_p11 = scmp.ne.s32.totalorder %s18_s30, %s1386_s12  ;;  %p1392_p13 = scmp.lt.s32.totalorder %s1386_s12, %s1386_s12 }
  0x1d   :  { %p1393_p0 = por %p1392_p13, %p1391_p12 }
  0x1f   :  { %p1394_p1 = pnand %p1393_p0, %p1387_p11 }
  0x21   :  { %1397 = shalt.err (!%p1394_p1)
}
  0x22   :  { %s1452_s1 = smov 128   ;;  %s1453_s13 = smov 8  }
  0x23   :  { %23 = dma.hbm_to_vmem [thread:$0]  %s1675_s0, 1024, %s18_s30, [#allocation6], %s1452_s1, %s1452_s1, %s1453_s13  }
  0x24   :  { %s1454_s16 = smov [#allocation10]   ;;  %s1398_s20 = scalar_lea.hbm %s1677_s2, 256 }
  0x25   :  { %s41_s17 = sshll.u32 %s1454_s16, 4  ;;  %p1399_p2 = scmp.ne.s32.totalorder %s1677_s2, %s1398_s20  ;;  %s42_s17 = int_to_ptr.vmem [resolvable:$true] %s41_s17 }
  0x26   :  { %p1402_p3 = scmp.lt.u32.totalorder %s1398_s20, %s1677_s2 }
  0x28   :  { %p1404_p4 = pnand %p1402_p3, %p1399_p2 }
  0x2a   :  { %1407 = shalt.err (!%p1404_p4)
}
  0x2b   :  { %s1408_s27 = scalar_lea.vmem %s42_s17, 256  ;;  %p1413_p6 = scmp.lt.s32.totalorder %s42_s17, %s42_s17 }
  0x2c   :  { %p1409_p5 = scmp.ne.s32.totalorder %s42_s17, %s1408_s27  ;;  %p1414_p7 = scmp.lt.s32.totalorder %s1408_s27, %s1408_s27 }
  0x2e   :  { %p1415_p8 = por %p1414_p7, %p1413_p6 }
  0x30   :  { %p1416_p9 = pnand %p1415_p8, %p1409_p5 }
  0x32   :  { %1419 = shalt.err (!%p1416_p9)
}
  0x33   :  { %47 = dma.hbm_to_vmem [thread:$0]  %s1677_s2, 256, %s42_s17, [#allocation9], %s1449_s25, %s1449_s25, %s1450_s26  }
  0x34   :  { %1442 = dma.done.wait [#allocation6], 1024  }
  0x35   :  { %1443 = vsyncadd [#allocation6], 4294966272 }
  0x36   :  { %1444 = dma.done.wait [#allocation9], 512  }
  0x37   :  { %1445 = vsyncadd [#allocation9], 4294966784  ;;  %vm64_vm0 = vcmask 261120   ;;  %v1455_v0 = vmov 0.0   ;;  %vm1456_vm1 = vmmov 0   ;;  %v1272_v1 = vld [vmem:[#allocation8] sm:$0xff]  }
  0x38   :  { %1184 = vmatprep.subr.bf16.mxu1 %v1455_v0  ;;  %1188 = vmatprep.mubr.msk.bf16.mxu1 %vm1456_vm1, %v1455_v0  ;;  %65 = vst.msk [vmem:[#allocation2] sm:$0xff] %vm64_vm0, %v1455_v0  ;;  %66 = vst.msk [vmem:[#allocation3] sm:$0xff] %vm64_vm0, %v1455_v0  ;;  %v1273_v2 = vld [vmem:[#allocation8 + $0x8] sm:$0xff]   ;;  %v67_v5 = vld [vmem:[#allocation5] sm:$0xff]  ;;  %s1457_s2 = smov 32   ;;  %s1458_s29 = smov 96  }
  0x39   :  { %1200 = vmatprep.subr.bf16.mxu0 %v1455_v0  ;;  %1204 = vmatprep.mubr.msk.bf16.mxu0 %vm1456_vm1, %v1455_v0  ;;  %v1274_v24 = vld [vmem:[#allocation8] sm:$0xff]   ;;  %v1275_v25 = vld [vmem:[#allocation8 + $0x8] sm:$0xff]   ;;  %v277_v60 = vld [vmem:[#allocation5 + $0x10] sm:$0xff] }
  0x3a   :  { %1185 = vmatpush3.bf16.msra.mxu1 %v1272_v1  ;;  %v172_v33 = vld [vmem:[#allocation5 + $0x8] sm:$0xff]  ;;  %v1276_v51 = vld [vmem:[#allocation8] sm:$0xff]  }
  0x3b   :  { %1186 = vmatprep.subr.bf16.mxu1 %v1455_v0  ;;  %1201 = vmatpush3.bf16.msra.mxu0 %v1276_v51  ;;  %v1277_v52 = vld [vmem:[#allocation8 + $0x8] sm:$0xff]   ;;  %v487_v51 = vld [vmem:[#allocation5 + $0x20] sm:$0xff] }
  0x3c   :  { %1202 = vmatprep.subr.bf16.mxu0 %v1455_v0 }
  0x3e   :  { %1187 = vmatpush3.bf16.msra.mxu1 %v1273_v2 }
  0x3f   :  { %v68_v3 = vld [vmem:[#allocation2] sm:$0xff]  ;;  %1192 = vmatprep.subr.bf16.mxu1 %v1455_v0  ;;  %v138_v12 = vld [vmem:[#allocation3] sm:$0xff]  ;;  %1203 = vmatpush3.bf16.msra.mxu0 %v1277_v52 }
  0x40   :  { %v69_v4 = vpack.c.bf16 %v68_v3, %v68_v3  ;;  %1216 = vmatprep.subr.bf16.mxu0 %v1455_v0 }
  0x42   :  { %1189 = vmatmul.mubr.msk.bf16.vlgmr.msra.gmra.mrb[0].mxu1 %vm64_vm0, %v69_v4 }
  0x43   :  { %1196 = vmatprep.mubr.msk.bf16.mxu1 %vm1456_vm1, %v1455_v0  ;;  %1193 = vmatpush3.bf16.msra.mxu1 %v1274_v24  ;;  %v382_v24 = vld [vmem:[#allocation5 + $0x18] sm:$0xff] }
  0x44   :  { %1194 = vmatprep.subr.bf16.mxu1 %v1455_v0 }
  0x47   :  { %1195 = vmatpush3.bf16.msra.mxu1 %v1275_v25 }
  0x48   :  { %1208 = vmatprep.subr.bf16.mxu1 %v1455_v0 }
 0x115   :  { %v124_v6 = vpop.f32.mrb[0].mxu1 }
 0x116   :  { %v130_v7 = vadd.f32 %v124_v6, %v67_v5  ;;  %v1190_v8 = vpop.f32.mrb[1].mxu1 }
 0x117   :  { %v127_v9 = vpop.f32.mrb[2].mxu1 }
 0x118   :  { %v1191_v10 = vpop.f32.mrb[3].mxu1  ;;  %1290 = vtanh.f32 %v130_v7  ;;  %v1079_v13 = vmul.f32 -1.442695, %v130_v7 }
 0x11a   :  { %1292 = vpow2.f32 %v1079_v13 }
 0x122   :  { %v1291_v11 = vpop.eup %1290 }
 0x123   :  { %145 = vrot.lane.b32.xlu0 %v1291_v11, %s1449_s25 }
 0x124   :  { %v1293_v14 = vpop.eup %1292 }
 0x125   :  { %v134_v15 = vadd.f32 1.0, %v1293_v14 }
 0x127   :  { %140 = vrot.lane.b32.xlu0 %v138_v12, %s1457_s2  ;;  %1294 = vrcp.f32 %v134_v15  ;;  %v1278_v15 = vld [vmem:[#allocation8] sm:$0xff]  }
 0x131   :  { %v1295_v16 = vpop.eup %1294 }
 0x195   :  { %v146_v17 = vpop.permute.xlu0 %145 }
 0x196   :  { %v148_v18 = vmul.f32 %v1295_v16, %v146_v17 }
 0x198   :  { %150 = vrot.lane.b32.xlu1 %v148_v18, %s1457_s2 }
 0x199   :  { %v141_v19 = vpop.permute.xlu0 %140 }
 0x19a   :  { %v143_v20 = vmul.f32 %v1295_v16, %v141_v19 }
 0x20a   :  { %v151_v21 = vpop.permute.xlu1 %150 }
 0x20b   :  { %v153_v22 = vadd.f32 %v151_v21, %v143_v20 }
 0x20d   :  { %1296 = vtanh.f32 %v153_v22 }
 0x217   :  { %v1297_v23 = vpop.eup %1296 }
 0x218   :  { %156 = vrot.lane.b32.xlu1 %v1297_v23, %s1449_s25 }
 0x21c   :  { %161 = vrot.lane.b32.xlu1 %v153_v22, %s1458_s29 }
 0x28a   :  { %v157_v26 = vpop.permute.xlu1 %156 }
 0x28b   :  { %v159_v27 = vmul.f32 %v1295_v16, %v157_v26  ;;  %v1279_v16 = vld [vmem:[#allocation8 + $0x8] sm:$0xff]  }
 0x28d   :  { %166 = vrot.lane.b32.xlu0 %v159_v27, %s1457_s2 }
 0x28e   :  { %v162_v28 = vpop.permute.xlu1 %161 }
 0x28f   :  { %164 = vst.msk [vmem:[#allocation3] sm:$0xff] %vm64_vm0, %v162_v28 }
 0x296   :  { %v242_v29 = vld [vmem:[#allocation3] sm:$0xff] }
 0x297   :  { %244 = vrot.lane.b32.xlu1 %v242_v29, %s1457_s2 }
 0x2ff   :  { %v167_v30 = vpop.permute.xlu0 %166 }
 0x300   :  { %169 = vst.msk [vmem:[#allocation2] sm:$0xff] %vm64_vm0, %v167_v30  ;;  %170 = vst.msk [vmem:[#allocation4] sm:$0xff] %vm64_vm0, %v167_v30 }
 0x307   :  { %v173_v31 = vld [vmem:[#allocation2] sm:$0xff] }
 0x308   :  { %v174_v32 = vpack.c.bf16 %v173_v31, %v173_v31 }
 0x309   :  { %v245_v46 = vpop.permute.xlu1 %244 }
 0x30a   :  { %1197 = vmatmul.mubr.msk.bf16.vlgmr.msra.gmra.mrb[4].mxu1 %vm64_vm0, %v174_v32 }
 0x30b   :  { %1212 = vmatprep.mubr.msk.bf16.mxu1 %vm1456_vm1, %v1455_v0  ;;  %1209 = vmatpush3.bf16.msra.mxu1 %v1278_v15  ;;  %v592_v15 = vld [vmem:[#allocation5 + $0x28] sm:$0xff] }
 0x30c   :  { %1210 = vmatprep.subr.bf16.mxu1 %v1455_v0 }
 0x30f   :  { %1211 = vmatpush3.bf16.msra.mxu1 %v1279_v16 }
 0x310   :  { %1224 = vmatprep.subr.bf16.mxu1 %v1455_v0 }
 0x3dd   :  { %v228_v34 = vpop.f32.mrb[4].mxu1 }
 0x3de   :  { %v234_v35 = vadd.f32 %v228_v34, %v172_v33  ;;  %v1198_v36 = vpop.f32.mrb[5].mxu1 }
 0x3df   :  { %v231_v37 = vpop.f32.mrb[6].mxu1 }
 0x3e0   :  { %1298 = vtanh.f32 %v234_v35  ;;  %v1199_v38 = vpop.f32.mrb[7].mxu1  ;;  %v1083_v40 = vmul.f32 -1.442695, %v234_v35 }
 0x3e2   :  { %1300 = vpow2.f32 %v1083_v40 }
 0x3ea   :  { %v1299_v39 = vpop.eup %1298 }
 0x3eb   :  { %249 = vrot.lane.b32.xlu0 %v1299_v39, %s1449_s25 }
 0x3ec   :  { %v1301_v41 = vpop.eup %1300 }
 0x3ed   :  { %v238_v42 = vadd.f32 1.0, %v1301_v41 }
 0x3ef   :  { %1302 = vrcp.f32 %v238_v42  ;;  %v1280_v42 = vld [vmem:[#allocation8] sm:$0xff]  }
 0x3f9   :  { %v1303_v43 = vpop.eup %1302 }
 0x3fa   :  { %v247_v47 = vmul.f32 %v1303_v43, %v245_v46 }
 0x45d   :  { %v250_v44 = vpop.permute.xlu0 %249 }
 0x45e   :  { %v252_v45 = vmul.f32 %v1303_v43, %v250_v44 }
 0x460   :  { %254 = vrot.lane.b32.xlu0 %v252_v45, %s1457_s2 }
 0x4d2   :  { %v255_v48 = vpop.permute.xlu0 %254 }
 0x4d3   :  { %v257_v49 = vadd.f32 %v255_v48, %v247_v47 }
 0x4d5   :  { %1304 = vtanh.f32 %v257_v49 }
 0x4df   :  { %v1305_v50 = vpop.eup %1304 }
 0x4e0   :  { %260 = vrot.lane.b32.xlu1 %v1305_v50, %s1449_s25 }
 0x4e4   :  { %265 = vrot.lane.b32.xlu1 %v257_v49, %s1458_s29 }
 0x552   :  { %v261_v53 = vpop.permute.xlu1 %260 }
 0x553   :  { %v263_v54 = vmul.f32 %v1303_v43, %v261_v53  ;;  %v1281_v43 = vld [vmem:[#allocation8 + $0x8] sm:$0xff]  }
 0x555   :  { %270 = vrot.lane.b32.xlu0 %v263_v54, %s1457_s2 }
 0x556   :  { %v266_v55 = vpop.permute.xlu1 %265 }
 0x557   :  { %268 = vst.msk [vmem:[#allocation3] sm:$0xff] %vm64_vm0, %v266_v55 }
 0x55e   :  { %v347_v56 = vld [vmem:[#allocation3] sm:$0xff] }
 0x55f   :  { %349 = vrot.lane.b32.xlu1 %v347_v56, %s1457_s2 }
 0x5c7   :  { %v271_v57 = vpop.permute.xlu0 %270 }
 0x5c8   :  { %273 = vst.msk [vmem:[#allocation2] sm:$0xff] %vm64_vm0, %v271_v57  ;;  %275 = vst.msk [vmem:[#allocation4 + $0x8] sm:$0xff] %vm64_vm0, %v271_v57 }
 0x5cf   :  { %v278_v58 = vld [vmem:[#allocation2] sm:$0xff] }
 0x5d0   :  { %v279_v59 = vpack.c.bf16 %v278_v58, %v278_v58 }
 0x5d1   :  { %v350_v10 = vpop.permute.xlu1 %349 }
 0x5d2   :  { %1205 = vmatmul.mubr.msk.bf16.vlgmr.msra.gmra.mrb[0].mxu0 %vm64_vm0, %v279_v59 }
 0x5d3   :  { %1220 = vmatprep.mubr.msk.bf16.mxu0 %vm1456_vm1, %v1455_v0  ;;  %1217 = vmatpush3.bf16.msra.mxu0 %v1280_v42 }
 0x5d4   :  { %1218 = vmatprep.subr.bf16.mxu0 %v1455_v0 }
 0x5d7   :  { %1219 = vmatpush3.bf16.msra.mxu0 %v1281_v43 }
 0x5d8   :  { %1232 = vmatprep.subr.bf16.mxu0 %v1455_v0 }
 0x6a5   :  { %v333_v61 = vpop.f32.mrb[0].mxu0 }
 0x6a6   :  { %v339_v62 = vadd.f32 %v333_v61, %v277_v60  ;;  %v1206_v63 = vpop.f32.mrb[1].mxu0 }
 0x6a7   :  { %v336_v1 = vpop.f32.mrb[2].mxu0 }
 0x6a8   :  { %1306 = vtanh.f32 %v339_v62  ;;  %v1207_v2 = vpop.f32.mrb[3].mxu0  ;;  %v1087_v4 = vmul.f32 -1.442695, %v339_v62 }
 0x6aa   :  { %1308 = vpow2.f32 %v1087_v4 }
 0x6b2   :  { %v1307_v3 = vpop.eup %1306 }
 0x6b3   :  { %354 = vrot.lane.b32.xlu0 %v1307_v3, %s1449_s25 }
 0x6b4   :  { %v1309_v5 = vpop.eup %1308 }
 0x6b5   :  { %v343_v6 = vadd.f32 1.0, %v1309_v5 }
 0x6b7   :  { %1310 = vrcp.f32 %v343_v6  ;;  %v1282_v6 = vld [vmem:[#allocation8] sm:$0xff]  }
 0x6c1   :  { %v1311_v7 = vpop.eup %1310 }
 0x6c2   :  { %v352_v11 = vmul.f32 %v1311_v7, %v350_v10 }
 0x725   :  { %v355_v8 = vpop.permute.xlu0 %354 }
 0x726   :  { %v357_v9 = vmul.f32 %v1311_v7, %v355_v8 }
 0x728   :  { %359 = vrot.lane.b32.xlu0 %v357_v9, %s1457_s2 }
 0x79a   :  { %v360_v12 = vpop.permute.xlu0 %359 }
 0x79b   :  { %v362_v13 = vadd.f32 %v360_v12, %v352_v11 }
 0x79d   :  { %1312 = vtanh.f32 %v362_v13 }
 0x7a7   :  { %v1313_v14 = vpop.eup %1312 }
 0x7a8   :  { %365 = vrot.lane.b32.xlu1 %v1313_v14, %s1449_s25 }
 0x7ac   :  { %370 = vrot.lane.b32.xlu1 %v362_v13, %s1458_s29 }
 0x81a   :  { %v366_v17 = vpop.permute.xlu1 %365 }
 0x81b   :  { %v368_v18 = vmul.f32 %v1311_v7, %v366_v17  ;;  %v1283_v7 = vld [vmem:[#allocation8 + $0x8] sm:$0xff]  }
 0x81d   :  { %375 = vrot.lane.b32.xlu0 %v368_v18, %s1457_s2 }
 0x81e   :  { %v371_v19 = vpop.permute.xlu1 %370 }
 0x81f   :  { %373 = vst.msk [vmem:[#allocation3] sm:$0xff] %vm64_vm0, %v371_v19 }
 0x826   :  { %v452_v20 = vld [vmem:[#allocation3] sm:$0xff] }
 0x827   :  { %454 = vrot.lane.b32.xlu1 %v452_v20, %s1457_s2 }
 0x88f   :  { %v376_v21 = vpop.permute.xlu0 %375 }
 0x890   :  { %378 = vst.msk [vmem:[#allocation2] sm:$0xff] %vm64_vm0, %v376_v21  ;;  %380 = vst.msk [vmem:[#allocation4 + $0x10] sm:$0xff] %vm64_vm0, %v376_v21 }
 0x897   :  { %v383_v22 = vld [vmem:[#allocation2] sm:$0xff] }
 0x898   :  { %v384_v23 = vpack.c.bf16 %v383_v22, %v383_v22 }
 0x899   :  { %v455_v37 = vpop.permute.xlu1 %454 }
 0x89a   :  { %1213 = vmatmul.mubr.msk.bf16.vlgmr.msra.gmra.mrb[8].mxu1 %vm64_vm0, %v384_v23 }
 0x89b   :  { %1228 = vmatprep.mubr.msk.bf16.mxu1 %vm1456_vm1, %v1455_v0  ;;  %1225 = vmatpush3.bf16.msra.mxu1 %v1282_v6 }
 0x89c   :  { %1226 = vmatprep.subr.bf16.mxu1 %v1455_v0 }
 0x89f   :  { %1227 = vmatpush3.bf16.msra.mxu1 %v1283_v7 }
 0x8a0   :  { %1240 = vmatprep.subr.bf16.mxu1 %v1455_v0 }
 0x96d   :  { %v438_v25 = vpop.f32.mrb[8].mxu1 }
 0x96e   :  { %v444_v26 = vadd.f32 %v438_v25, %v382_v24  ;;  %v1214_v27 = vpop.f32.mrb[9].mxu1 }
 0x96f   :  { %v441_v28 = vpop.f32.mrb[10].mxu1 }
 0x970   :  { %1314 = vtanh.f32 %v444_v26  ;;  %v1215_v29 = vpop.f32.mrb[11].mxu1  ;;  %v1091_v31 = vmul.f32 -1.442695, %v444_v26 }
 0x972   :  { %1316 = vpow2.f32 %v1091_v31 }
 0x97a   :  { %v1315_v30 = vpop.eup %1314 }
 0x97b   :  { %459 = vrot.lane.b32.xlu0 %v1315_v30, %s1449_s25 }
 0x97c   :  { %v1317_v32 = vpop.eup %1316 }
 0x97d   :  { %v448_v33 = vadd.f32 1.0, %v1317_v32 }
 0x97f   :  { %1318 = vrcp.f32 %v448_v33  ;;  %v1284_v33 = vld [vmem:[#allocation8] sm:$0xff]  }
 0x989   :  { %v1319_v34 = vpop.eup %1318 }
 0x98a   :  { %v457_v38 = vmul.f32 %v1319_v34, %v455_v37 }
 0x9ed   :  { %v460_v35 = vpop.permute.xlu0 %459 }
 0x9ee   :  { %v462_v36 = vmul.f32 %v1319_v34, %v460_v35  ;;  %v1286_v35 = vld [vmem:[#allocation10] sm:$0xff]  }
 0x9f0   :  { %464 = vrot.lane.b32.xlu0 %v462_v36, %s1457_s2 }
 0xa62   :  { %v465_v39 = vpop.permute.xlu0 %464 }
 0xa63   :  { %v467_v40 = vadd.f32 %v465_v39, %v457_v38 }
 0xa65   :  { %1320 = vtanh.f32 %v467_v40 }
 0xa6f   :  { %v1321_v41 = vpop.eup %1320 }
 0xa70   :  { %470 = vrot.lane.b32.xlu1 %v1321_v41, %s1449_s25  ;;  %v907_v41 = vld [vmem:[#allocation4 + $0x8] sm:$0xff] }
 0xa74   :  { %475 = vrot.lane.b32.xlu1 %v467_v40, %s1458_s29 }
 0xae2   :  { %v471_v44 = vpop.permute.xlu1 %470 }
 0xae3   :  { %v473_v45 = vmul.f32 %v1319_v34, %v471_v44  ;;  %v1285_v34 = vld [vmem:[#allocation8 + $0x8] sm:$0xff]   ;;  %v906_v44 = vld [vmem:[#allocation4] sm:$0xff] }
 0xae5   :  { %480 = vrot.lane.b32.xlu0 %v473_v45, %s1457_s2  ;;  %v1287_v45 = vld [vmem:[#allocation10 + $0x8] sm:$0xff]  }
 0xae6   :  { %v476_v46 = vpop.permute.xlu1 %475 }
 0xae7   :  { %478 = vst.msk [vmem:[#allocation3] sm:$0xff] %vm64_vm0, %v476_v46  ;;  %v914_v46 = vpack.c.bf16 %v907_v41, %v906_v44 }
 0xaee   :  { %v557_v47 = vld [vmem:[#allocation3] sm:$0xff] }
 0xaef   :  { %559 = vrot.lane.b32.xlu1 %v557_v47, %s1457_s2 }
 0xb57   :  { %v481_v48 = vpop.permute.xlu0 %480 }
 0xb58   :  { %483 = vst.msk [vmem:[#allocation2] sm:$0xff] %vm64_vm0, %v481_v48  ;;  %485 = vst.msk [vmem:[#allocation4 + $0x18] sm:$0xff] %vm64_vm0, %v481_v48 }
 0xb5f   :  { %v488_v49 = vld [vmem:[#allocation2] sm:$0xff]  ;;  %v909_v47 = vld [vmem:[#allocation4 + $0x18] sm:$0xff] }
 0xb60   :  { %v489_v50 = vpack.c.bf16 %v488_v49, %v488_v49  ;;  %v908_v49 = vld [vmem:[#allocation4 + $0x10] sm:$0xff] }
 0xb61   :  { %v560_v1 = vpop.permute.xlu1 %559 }
 0xb62   :  { %1221 = vmatmul.mubr.msk.bf16.vlgmr.msra.gmra.mrb[4].mxu0 %vm64_vm0, %v489_v50  ;;  %v915_v50 = vpack.c.bf16 %v909_v47, %v908_v49 }
 0xb63   :  { %1236 = vmatprep.mubr.msk.bf16.mxu0 %vm1456_vm1, %v1455_v0  ;;  %1233 = vmatpush3.bf16.msra.mxu0 %v1284_v33 }
 0xb64   :  { %1234 = vmatprep.subr.bf16.mxu0 %v1455_v0 }
 0xb67   :  { %1235 = vmatpush3.bf16.msra.mxu0 %v1285_v34 }
 0xb68   :  { %1248 = vmatprep.subr.bf16.mxu0 %v1286_v35 }
 0xc35   :  { %v543_v52 = vpop.f32.mrb[4].mxu0 }
 0xc36   :  { %v549_v53 = vadd.f32 %v543_v52, %v487_v51  ;;  %v1222_v54 = vpop.f32.mrb[5].mxu0 }
 0xc37   :  { %v546_v55 = vpop.f32.mrb[6].mxu0 }
 0xc38   :  { %1322 = vtanh.f32 %v549_v53  ;;  %v1223_v56 = vpop.f32.mrb[7].mxu0  ;;  %v1095_v58 = vmul.f32 -1.442695, %v549_v53  ;;  %v697_v53 = vld [vmem:[#allocation5 + $0x30] sm:$0xff] }
 0xc3a   :  { %1324 = vpow2.f32 %v1095_v58 }
 0xc42   :  { %v1323_v57 = vpop.eup %1322 }
 0xc43   :  { %564 = vrot.lane.b32.xlu0 %v1323_v57, %s1449_s25 }
 0xc44   :  { %v1325_v59 = vpop.eup %1324 }
 0xc45   :  { %v553_v60 = vadd.f32 1.0, %v1325_v59 }
 0xc47   :  { %1326 = vrcp.f32 %v553_v60  ;;  %v1630_v60 = vld [vmem:[%s1678_s3] ss:$0 sm:$0xff]  ;;  %s1459_s3 = smov [#allocation11]  }
 0xc48   :  { %s1063_s6 = sshll.u32 %s1459_s3, 4  ;;  %s1064_s6 = int_to_ptr.vmem [resolvable:$true] %s1063_s6 }
 0xc49   :  { %s1420_s7 = scalar_lea.vmem %s1064_s6, 512  ;;  %p1425_p11 = scmp.lt.s32.totalorder %s1064_s6, %s1064_s6 }
 0xc4a   :  { %p1421_p10 = scmp.ne.s32.totalorder %s1064_s6, %s1420_s7  ;;  %p1426_p12 = scmp.lt.s32.totalorder %s1420_s7, %s1420_s7 }
 0xc4c   :  { %p1427_p13 = por %p1426_p12, %p1425_p11 }
 0xc4e   :  { %p1428_p0 = pnand %p1427_p13, %p1421_p10 }
 0xc51   :  { %v1327_v61 = vpop.eup %1326 }
 0xc52   :  { %v562_v2 = vmul.f32 %v1327_v61, %v560_v1 }
 0xcb5   :  { %v565_v62 = vpop.permute.xlu0 %564 }
 0xcb6   :  { %v567_v63 = vmul.f32 %v1327_v61, %v565_v62 }
 0xcb8   :  { %569 = vrot.lane.b32.xlu0 %v567_v63, %s1457_s2 }
 0xd2a   :  { %v570_v3 = vpop.permute.xlu0 %569 }
 0xd2b   :  { %v572_v4 = vadd.f32 %v570_v3, %v562_v2 }
 0xd2d   :  { %1328 = vtanh.f32 %v572_v4 }
 0xd37   :  { %v1329_v5 = vpop.eup %1328 }
 0xd38   :  { %575 = vrot.lane.b32.xlu1 %v1329_v5, %s1449_s25 }
 0xd3c   :  { %580 = vrot.lane.b32.xlu1 %v572_v4, %s1458_s29 }
 0xdaa   :  { %v576_v8 = vpop.permute.xlu1 %575 }
 0xdab   :  { %v578_v9 = vmul.f32 %v1327_v61, %v576_v8 }
 0xdad   :  { %585 = vrot.lane.b32.xlu0 %v578_v9, %s1457_s2 }
 0xdae   :  { %v581_v10 = vpop.permute.xlu1 %580 }
 0xdaf   :  { %583 = vst.msk [vmem:[#allocation3] sm:$0xff] %vm64_vm0, %v581_v10 }
 0xdb6   :  { %v662_v11 = vld [vmem:[#allocation3] sm:$0xff] }
 0xdb7   :  { %664 = vrot.lane.b32.xlu1 %v662_v11, %s1457_s2 }
 0xe1f   :  { %v586_v12 = vpop.permute.xlu0 %585 }
 0xe20   :  { %588 = vst.msk [vmem:[#allocation2] sm:$0xff] %vm64_vm0, %v586_v12  ;;  %590 = vst.msk [vmem:[#allocation4 + $0x20] sm:$0xff] %vm64_vm0, %v586_v12 }
 0xe27   :  { %v593_v13 = vld [vmem:[#allocation2] sm:$0xff]  ;;  %v910_v51 = vld [vmem:[#allocation4 + $0x20] sm:$0xff] }
 0xe28   :  { %v594_v14 = vpack.c.bf16 %v593_v13, %v593_v13 }
 0xe29   :  { %v665_v28 = vpop.permute.xlu1 %664 }
 0xe2a   :  { %1229 = vmatmul.mubr.msk.bf16.vlgmr.msra.gmra.mrb[12].mxu1 %vm64_vm0, %v594_v14 }
 0xe2b   :  { %1244 = vmatprep.mubr.msk.bf16.mxu1 %vm1456_vm1, %v1455_v0 }
 0xefd   :  { %v648_v16 = vpop.f32.mrb[12].mxu1 }
 0xefe   :  { %v654_v17 = vadd.f32 %v648_v16, %v592_v15  ;;  %v1230_v18 = vpop.f32.mrb[13].mxu1 }
 0xeff   :  { %v651_v19 = vpop.f32.mrb[14].mxu1 }
 0xf00   :  { %1330 = vtanh.f32 %v654_v17  ;;  %v1231_v20 = vpop.f32.mrb[15].mxu1  ;;  %v1099_v22 = vmul.f32 -1.442695, %v654_v17  ;;  %v1288_v19 = vld [vmem:[#allocation8] sm:$0xff]  }
 0xf01   :  { %1241 = vmatpush3.bf16.msra.mxu1 %v1288_v19  ;;  %v1289_v20 = vld [vmem:[#allocation8 + $0x8] sm:$0xff]  }
 0xf02   :  { %1332 = vpow2.f32 %v1099_v22  ;;  %1242 = vmatprep.subr.bf16.mxu1 %v1455_v0  ;;  %v802_v0 = vld [vmem:[#allocation5 + $0x38] sm:$0xff] }
 0xf05   :  { %1243 = vmatpush3.bf16.msra.mxu1 %v1289_v20 }
 0xf0a   :  { %v1331_v21 = vpop.eup %1330 }
 0xf0b   :  { %669 = vrot.lane.b32.xlu0 %v1331_v21, %s1449_s25 }
 0xf0c   :  { %v1333_v23 = vpop.eup %1332 }
 0xf0d   :  { %v658_v24 = vadd.f32 1.0, %v1333_v23 }
 0xf0f   :  { %1334 = vrcp.f32 %v658_v24 }
 0xf19   :  { %v1335_v25 = vpop.eup %1334 }
 0xf1a   :  { %v667_v29 = vmul.f32 %v1335_v25, %v665_v28 }
 0xf7d   :  { %v670_v26 = vpop.permute.xlu0 %669 }
 0xf7e   :  { %v672_v27 = vmul.f32 %v1335_v25, %v670_v26 }
 0xf80   :  { %674 = vrot.lane.b32.xlu0 %v672_v27, %s1457_s2 }
 0xff2   :  { %v675_v30 = vpop.permute.xlu0 %674 }
 0xff3   :  { %v677_v31 = vadd.f32 %v675_v30, %v667_v29 }
 0xff5   :  { %1336 = vtanh.f32 %v677_v31 }
 0xfff   :  { %v1337_v32 = vpop.eup %1336 }
0x1000   :  { %680 = vrot.lane.b32.xlu1 %v1337_v32, %s1449_s25 }
0x1004   :  { %685 = vrot.lane.b32.xlu1 %v677_v31, %s1458_s29 }
0x1072   :  { %v681_v36 = vpop.permute.xlu1 %680 }
0x1073   :  { %v683_v37 = vmul.f32 %v1335_v25, %v681_v36 }
0x1075   :  { %690 = vrot.lane.b32.xlu0 %v683_v37, %s1457_s2 }
0x1076   :  { %v686_v38 = vpop.permute.xlu1 %685 }
0x1077   :  { %688 = vst.msk [vmem:[#allocation3] sm:$0xff] %vm64_vm0, %v686_v38 }
0x107e   :  { %v767_v39 = vld [vmem:[#allocation3] sm:$0xff] }
0x107f   :  { %769 = vrot.lane.b32.xlu1 %v767_v39, %s1457_s2 }
0x10e7   :  { %v691_v40 = vpop.permute.xlu0 %690 }
0x10e8   :  { %693 = vst.msk [vmem:[#allocation2] sm:$0xff] %vm64_vm0, %v691_v40  ;;  %695 = vst.msk [vmem:[#allocation4 + $0x28] sm:$0xff] %vm64_vm0, %v691_v40 }
0x10ef   :  { %v698_v42 = vld [vmem:[#allocation2] sm:$0xff]  ;;  %v911_v48 = vld [vmem:[#allocation4 + $0x28] sm:$0xff] }
0x10f0   :  { %v699_v43 = vpack.c.bf16 %v698_v42, %v698_v42  ;;  %v916_v52 = vpack.c.bf16 %v911_v48, %v910_v51 }
0x10f1   :  { %v770_v14 = vpop.permute.xlu1 %769 }
0x10f2   :  { %1237 = vmatmul.mubr.msk.bf16.vlgmr.msra.gmra.mrb[8].mxu0 %vm64_vm0, %v699_v43 }
0x10f3   :  { %1249 = vmatpush3.bf16.msra.mxu0 %v1286_v35  ;;  %1252 = vmatprep.mubr.msk.bf16.mxu0 %vm64_vm0, %v914_v46 }
0x10f4   :  { %1250 = vmatprep.subr.bf16.mxu0 %v1287_v45 }
0x10f7   :  { %1251 = vmatpush3.bf16.msra.mxu0 %v1287_v45 }
0x10fa   :  { %1253 = vmatmul.mubr.msk.bf16.vlgmr.msra.gmra.mrb[12].mxu0 %vm64_vm0, %v915_v50 }
0x10fb   :  { %1256 = vmatprep.mubr.msk.bf16.mxu0 %vm64_vm0, %v916_v52 }
0x11c5   :  { %v753_v54 = vpop.f32.mrb[8].mxu0 }
0x11c6   :  { %v759_v55 = vadd.f32 %v753_v54, %v697_v53  ;;  %v1238_v56 = vpop.f32.mrb[9].mxu0 }
0x11c7   :  { %v756_v57 = vpop.f32.mrb[10].mxu0 }
0x11c8   :  { %1338 = vtanh.f32 %v759_v55  ;;  %v1239_v58 = vpop.f32.mrb[11].mxu0  ;;  %v1103_v8 = vmul.f32 -1.442695, %v759_v55 }
0x11ca   :  { %1340 = vpow2.f32 %v1103_v8 }
0x11cd   :  { %v1254_v59 = vpop.f32.mrb[12].mxu0 }
0x11ce   :  { %v987_v61 = vpop.f32.mrb[13].mxu0  ;;  %v996_v63 = vadd.f32 %v1254_v59, %v1630_v60 }
0x11cf   :  { %v1255_v62 = vpop.f32.mrb[14].mxu0  ;;  %v988_v3 = vadd.f32 %v1630_v60, %v987_v61 }
0x11d0   :  { %v999_v1 = vadd.f32 %v1255_v62, %v1630_v60  ;;  %v990_v2 = vpop.f32.mrb[15].mxu0 }
0x11d1   :  { %v991_v4 = vadd.f32 %v1630_v60, %v990_v2 }
0x11d2   :  { %v1339_v5 = vpop.eup %1338  ;;  %v1139_v6 = vpack.c.bf16 %v999_v1, %v996_v63 }
0x11d3   :  { %v1134_v7 = vpack.c.bf16 %v991_v4, %v988_v3  ;;  %774 = vrot.lane.b32.xlu0 %v1339_v5, %s1449_s25 }
0x11d4   :  { %1151 = vst [vmem:[#allocation11 + $0x8] sm:$0xff] %v1139_v6   ;;  %v1341_v9 = vpop.eup %1340 }
0x11d5   :  { %1135 = vst [vmem:[#allocation11] sm:$0xff] %v1134_v7   ;;  %v763_v10 = vadd.f32 1.0, %v1341_v9 }
0x11d7   :  { %1342 = vrcp.f32 %v763_v10 }
0x11e1   :  { %v1343_v11 = vpop.eup %1342 }
0x11e2   :  { %v772_v15 = vmul.f32 %v1343_v11, %v770_v14 }
0x1245   :  { %v775_v12 = vpop.permute.xlu0 %774 }
0x1246   :  { %v777_v13 = vmul.f32 %v1343_v11, %v775_v12 }
0x1248   :  { %779 = vrot.lane.b32.xlu0 %v777_v13, %s1457_s2 }
0x12ba   :  { %v780_v16 = vpop.permute.xlu0 %779 }
0x12bb   :  { %v782_v17 = vadd.f32 %v780_v16, %v772_v15 }
0x12bd   :  { %1344 = vtanh.f32 %v782_v17 }
0x12c7   :  { %v1345_v18 = vpop.eup %1344 }
0x12c8   :  { %785 = vrot.lane.b32.xlu1 %v1345_v18, %s1449_s25 }
0x12cc   :  { %790 = vrot.lane.b32.xlu1 %v782_v17, %s1458_s29 }
0x133a   :  { %v786_v21 = vpop.permute.xlu1 %785 }
0x133b   :  { %v788_v22 = vmul.f32 %v1343_v11, %v786_v21 }
0x133d   :  { %795 = vrot.lane.b32.xlu0 %v788_v22, %s1457_s2 }
0x133e   :  { %v791_v23 = vpop.permute.xlu1 %790 }
0x133f   :  { %793 = vst.msk [vmem:[#allocation3] sm:$0xff] %vm64_vm0, %v791_v23 }
0x1346   :  { %v872_v24 = vld [vmem:[#allocation3] sm:$0xff] }
0x1347   :  { %874 = vrot.lane.b32.xlu1 %v872_v24, %s1457_s2 }
0x13af   :  { %v796_v25 = vpop.permute.xlu0 %795 }
0x13b0   :  { %798 = vst.msk [vmem:[#allocation2] sm:$0xff] %vm64_vm0, %v796_v25  ;;  %800 = vst.msk [vmem:[#allocation4 + $0x30] sm:$0xff] %vm64_vm0, %v796_v25 }
0x13b7   :  { %v803_v26 = vld [vmem:[#allocation2] sm:$0xff] }
0x13b8   :  { %v804_v27 = vpack.c.bf16 %v803_v26, %v803_v26  ;;  %v912_v49 = vld [vmem:[#allocation4 + $0x30] sm:$0xff] }
0x13b9   :  { %v875_v40 = vpop.permute.xlu1 %874 }
0x13ba   :  { %1245 = vmatmul.mubr.msk.bf16.vlgmr.msra.gmra.mrb[16].mxu1 %vm64_vm0, %v804_v27 }
0x148d   :  { %v858_v28 = vpop.f32.mrb[16].mxu1 }
0x148e   :  { %v864_v29 = vadd.f32 %v858_v28, %v802_v0  ;;  %v1246_v30 = vpop.f32.mrb[17].mxu1 }
0x148f   :  { %v861_v31 = vpop.f32.mrb[18].mxu1 }
0x1490   :  { %1346 = vtanh.f32 %v864_v29  ;;  %v1247_v32 = vpop.f32.mrb[19].mxu1  ;;  %v1107_v34 = vmul.f32 -1.442695, %v864_v29 }
0x1492   :  { %1348 = vpow2.f32 %v1107_v34 }
0x149a   :  { %v1347_v33 = vpop.eup %1346 }
0x149b   :  { %879 = vrot.lane.b32.xlu0 %v1347_v33, %s1449_s25 }
0x149c   :  { %v1349_v35 = vpop.eup %1348 }
0x149d   :  { %v868_v36 = vadd.f32 1.0, %v1349_v35 }
0x149f   :  { %1350 = vrcp.f32 %v868_v36 }
0x14a9   :  { %v1351_v37 = vpop.eup %1350 }
0x14aa   :  { %v877_v41 = vmul.f32 %v1351_v37, %v875_v40 }
0x150d   :  { %v880_v38 = vpop.permute.xlu0 %879 }
0x150e   :  { %v882_v39 = vmul.f32 %v1351_v37, %v880_v38 }
0x1510   :  { %884 = vrot.lane.b32.xlu0 %v882_v39, %s1457_s2 }
0x1582   :  { %v885_v42 = vpop.permute.xlu0 %884 }
0x1583   :  { %v887_v43 = vadd.f32 %v885_v42, %v877_v41 }
0x1585   :  { %1352 = vtanh.f32 %v887_v43 }
0x158f   :  { %v1353_v44 = vpop.eup %1352 }
0x1590   :  { %890 = vrot.lane.b32.xlu1 %v1353_v44, %s1449_s25 }
0x1594   :  { %895 = vrot.lane.b32.xlu1 %v887_v43, %s1458_s29 }
0x1602   :  { %v891_v45 = vpop.permute.xlu1 %890 }
0x1603   :  { %v893_v46 = vmul.f32 %v1351_v37, %v891_v45 }
0x1605   :  { %900 = vrot.lane.b32.xlu0 %v893_v46, %s1457_s2 }
0x1606   :  { %v896_v47 = vpop.permute.xlu1 %895 }
0x1607   :  { %898 = vst.msk [vmem:[#allocation3] sm:$0xff] %vm64_vm0, %v896_v47 }
0x1677   :  { %v901_v48 = vpop.permute.xlu0 %900 }
0x1678   :  { %903 = vst.msk [vmem:[#allocation2] sm:$0xff] %vm64_vm0, %v901_v48  ;;  %905 = vst.msk [vmem:[#allocation4 + $0x38] sm:$0xff] %vm64_vm0, %v901_v48 }
0x167f   :  { %v913_v50 = vld [vmem:[#allocation4 + $0x38] sm:$0xff] }
0x1680   :  { %v917_v51 = vpack.c.bf16 %v913_v50, %v912_v49 }
0x1682   :  { %1257 = vmatmul.mubr.msk.bf16.gmra.mrb[16].mxu0 %vm64_vm0, %v917_v51 }
0x1755   :  { %v1258_v52 = vpop.f32.mrb[16].mxu0 }
0x1756   :  { %v1003_v53 = vpop.f32.mrb[17].mxu0  ;;  %v1012_v55 = vadd.f32 %v1258_v52, %v1630_v60 }
0x1757   :  { %v1259_v54 = vpop.f32.mrb[18].mxu0  ;;  %v1004_v58 = vadd.f32 %v1630_v60, %v1003_v53 }
0x1758   :  { %v1015_v56 = vadd.f32 %v1259_v54, %v1630_v60  ;;  %v1006_v57 = vpop.f32.mrb[19].mxu0 }
0x1759   :  { %v1007_v59 = vadd.f32 %v1630_v60, %v1006_v57 }
0x175a   :  { %v1149_v61 = vpack.c.bf16 %v1015_v56, %v1012_v55 }
0x175b   :  { %v1144_v62 = vpack.c.bf16 %v1007_v59, %v1004_v58 }
0x175c   :  { %1153 = vst [vmem:[#allocation11 + $0x18] sm:$0xff] %v1149_v61  }
0x175d   :  { %1152 = vst [vmem:[#allocation11 + $0x10] sm:$0xff] %v1144_v62  }
0x175e   :  { %1431 = shalt.err (!%p1428_p0)
}
0x175f   :  { %s1432_s10 = scalar_lea.hbm %s1679_s4, 512 }
0x1760   :  { %p1433_p1 = scmp.ne.s32.totalorder %s1679_s4, %s1432_s10  ;;  %p1436_p2 = scmp.lt.u32.totalorder %s1432_s10, %s1679_s4 }
0x1762   :  { %p1438_p3 = pnand %p1436_p2, %p1433_p1 }
0x1764   :  { %1441 = shalt.err (!%p1438_p3)
}
0x1765   :  { %1069 = dma.vmem_to_hbm [thread:$0]  %s1064_s6, 512, %s1679_s4, [#allocation7], %s1449_s25, %s1449_s25, %s1450_s26  }
0x1766   :  { %1446 = dma.done.wait [#allocation7], 512  }
0x1767   :  { %1447 = vsyncadd [#allocation7], 4294966784 }
0x1768   :  { %1073 = vsyncpa [#allocation6], 1 }
0x1769   :  { %1074 = vsyncpa [#allocation9], 1 }
0x176a   :  { %1075 = vsyncpa [#allocation7], 1 }

</bundles_post_ra>
